<compile_context>
chip_gen: v6e
topology: v6e:2x2x1
jax: 0.10.0
libtpu: 0.0.40
codegen_flags: <defaults>
</compile_context>

<pallas_src>
import functools

import numpy as np
import jax
import jax.numpy as jnp
from jax import lax
from jax.experimental import pallas as pl
from jax.experimental.pallas import tpu as pltpu


def _bottleneck_kernel(x_ref, halo_ref, w1_ref, b1_ref, w2_ref, b2_ref,
                       w3_ref, b3_ref, out_ref):
    """One (batch, H-tile) step of the fused bottleneck block.

    x_ref    : (1, tile_h, W, Cin)   input row tile (also the residual path)
    halo_ref : (1, 2, W, Cin)        row above / row below the tile
    w1_ref   : (Cin, width)          bf16, BN1 scale folded in
    w2_ref   : (3, 3*width, width)   bf16 per-kh im2col blocks, rows = (kw, ci)
    w3_ref   : (width, Cout)         bf16, BN3 scale folded in
    b*_ref   : (1, C)                f32 folded BN biases
    out_ref  : (1, tile_h, W, Cout)
    """
    _, tile_h, W, Cin = x_ref.shape
    width = w1_ref.shape[1]
    Cout = w3_ref.shape[1]
    f32, bf16 = jnp.float32, jnp.bfloat16
    M = tile_h * W              # output rows of this tile (row-major (h, w))
    ME = (tile_h + 2) * W       # rows including the two halo image-rows

    i = pl.program_id(1)
    last = pl.num_programs(1) - 1

    # --- conv1 (1x1) + folded BN1 + ReLU on the tile and on the 2 halo rows --
    xt = x_ref[...].reshape(M, Cin)                 # f32; reused as residual
    ht = halo_ref[...].reshape(2 * W, Cin)
    h1_tile = jnp.maximum(
        jnp.dot(xt.astype(bf16), w1_ref[...], preferred_element_type=f32)
        + b1_ref[...], 0.0)                                         # (M, width)
    h1_halo = jnp.maximum(
        jnp.dot(ht.astype(bf16), w1_ref[...], preferred_element_type=f32)
        + b1_ref[...], 0.0)                                         # (2W, width)

    # Halo rows standing in for conv2's zero padding at the image top/bottom
    # must be exactly zero (conv1 of a zero row is relu(bias) != 0). Only the
    # 2*W halo rows are masked -- no full-tile select.
    h1_top = jnp.where(i == 0, 0.0, h1_halo[:W])
    h1_bot = jnp.where(i == last, 0.0, h1_halo[W:])
    h1 = jnp.concatenate([h1_top, h1_tile, h1_bot], axis=0)         # (ME, width)

    # --- conv2 (3x3, pad=1): 3-way channel concat + 3 accumulated matmuls ----
    # In the row-major (h, w) flattening a +-1 column shift is a +-1 row shift;
    # wrapped edge columns are masked to zero (conv2's width padding).
    col = lax.broadcasted_iota(jnp.int32, (tile_h + 2, W, 1), 1).reshape(ME, 1)
    zrow = jnp.zeros((1, width), f32)
    left = jnp.where(col == 0, 0.0,
                     jnp.concatenate([zrow, h1[:ME - 1]], axis=0))   # reads c-1
    right = jnp.where(col == W - 1, 0.0,
                      jnp.concatenate([h1[1:], zrow], axis=0))       # reads c+1
    buf = jnp.concatenate([left, h1, right], axis=-1).astype(bf16)   # (ME, 3*width)

    acc = jnp.dot(buf[0 * W:0 * W + M], w2_ref[0], preferred_element_type=f32)
    acc = acc + jnp.dot(buf[1 * W:1 * W + M], w2_ref[1], preferred_element_type=f32)
    acc = acc + jnp.dot(buf[2 * W:2 * W + M], w2_ref[2], preferred_element_type=f32)
    h2 = jnp.maximum(acc + b2_ref[...], 0.0)                         # (M, width)

    # --- conv3 (1x1) + folded BN3 + residual add + ReLU ----------------------
    h3 = jnp.dot(h2.astype(bf16), w3_ref[...], preferred_element_type=f32)
    out = jnp.maximum(h3 + b3_ref[...] + xt, 0.0)    # Cin == Cout, stride == 1
    out_ref[...] = out.reshape(1, tile_h, W, Cout).astype(out_ref.dtype)


def _fold_bn(gamma, beta, mean, var, eps=1e-5):
    scale = gamma / jnp.sqrt(var + eps)
    return scale, beta - mean * scale


def _vmem_limits():
    """Generation-aware VMEM sizing: big tiles on v5e/v6e (128 MiB VMEM),
    conservative on v7x (64 MiB / TensorCore)."""
    phys = 64 * 1024 * 1024
    try:
        info = pltpu.get_tpu_info()
        phys = int(getattr(info, "vmem_capacity_bytes", phys))
    except Exception:
        pass
    limit = max(32 * 1024 * 1024, min(phys - 16 * 1024 * 1024, 112 * 1024 * 1024))
    return limit, (limit * 3) // 4


def _pick_tile_h(H, W, cin, width, cout, budget_bytes):
    """Largest divisor of H whose per-step working set (activations +
    double-buffered I/O tiles + double-buffered bf16 weights) fits the budget."""
    w_bytes = 2 * 2 * (cin * width + 9 * width * width + width * cout)  # bf16 x2 buf
    b_bytes = 2 * 4 * (2 * width + cout)

    def step_bytes(th):
        me, m = (th + 2) * W, th * W
        io = 2 * 4 * (m * cin + 2 * W * cin + m * cout)   # double-buffered tiles
        act = (3 * me * width * 4        # h1 + left/right shifted copies (f32)
               + me * 3 * width * 2      # bf16 patch buffer
               + m * width * 4           # conv2 accumulator
               + m * (cin + width) * 2   # bf16 casts
               + 2 * m * cout * 4)       # h3 / out staging
        return io + act + w_bytes + b_bytes

    for th in range(H, 0, -1):
        if H % th == 0 and step_bytes(th) <= budget_bytes:
            return th
    return 1


def bottleneck_forward(x, params, *, tile_h=None, eps=1e-5,
                       out_dtype=jnp.float32, nhwc_io=False):
    """Fused Bottleneck forward.

    x: (N, Cin, H, W) float32 (NCHW, like the PyTorch module) unless
    nhwc_io=True, in which case x is NHWC and the output is NHWC (lets a
    caller carry NHWC through the model and skip the wrapper transposes).
    """
    xh = x if nhwc_io else jnp.transpose(x, (0, 2, 3, 1))
    xh = xh.astype(jnp.float32)
    N, H, W, Cin = xh.shape
    width = params["conv1_w"].shape[0]
    Cout = params["conv3_w"].shape[0]
    if Cin != Cout:
        # TODO(synk): projection-downsample / stride>1 residual branch not implemented.
        raise NotImplementedError("identity residual needs inplanes == planes*expansion")

    vmem_limit, vmem_budget = _vmem_limits()
    if tile_h is None:
        tile_h = _pick_tile_h(H, W, Cin, width, Cout, vmem_budget)
    assert H % tile_h == 0, (H, tile_h)
    n_h = H // tile_h

    # Fold BN scale into the conv weights (conv is linear); keep f32 biases.
    s1, b1 = _fold_bn(params["bn1_g"], params["bn1_b"], params["bn1_m"], params["bn1_v"], eps)
    s2, b2 = _fold_bn(params["bn2_g"], params["bn2_b"], params["bn2_m"], params["bn2_v"], eps)
    s3, b3 = _fold_bn(params["bn3_g"], params["bn3_b"], params["bn3_m"], params["bn3_v"], eps)

    # TODO(synk): for real ResNet widths, pad width/Cout up to multiples of 128
    # (lane-dense MXU columns, unmasked vst) and slice the output back.
    w1 = jnp.transpose(params["conv1_w"][:, :, 0, 0] * s1[:, None], (1, 0))        # (Cin, width)
    w2 = jnp.transpose(params["conv2_w"] * s2[:, None, None, None], (2, 3, 1, 0))  # (kh,kw,ci,co)
    w2 = w2.reshape(3, 3 * width, width)             # per-kh blocks, rows = (kw, ci)
    w3 = jnp.transpose(params["conv3_w"][:, :, 0, 0] * s3[:, None], (1, 0))        # (width, Cout)
    w1 = w1.astype(jnp.bfloat16)
    w2 = w2.astype(jnp.bfloat16)
    w3 = w3.astype(jnp.bfloat16)
    b1 = b1.reshape(1, -1).astype(jnp.float32)
    b2 = b2.reshape(1, -1).astype(jnp.float32)
    b3 = b3.reshape(1, -1).astype(jnp.float32)

    # Halo rows (row above / below each H-tile), zeros at the image boundary.
    # Built from two strided row gathers + zero rows (no full padded x copy).
    # Shape (N, 2*n_h, W, Cin): rows [2i, 2i+1] belong to H-tile i.
    zero_row = jnp.zeros((N, 1, W, Cin), jnp.float32)
    tops = jnp.concatenate([zero_row, xh[:, tile_h - 1:H - 1:tile_h]], axis=1)   # (N,n_h,W,Cin)
    bots = jnp.concatenate([xh[:, tile_h:H:tile_h], zero_row], axis=1)           # (N,n_h,W,Cin)
    halo = jnp.stack([tops, bots], axis=2).reshape(N, 2 * n_h, W, Cin)

    out_itemsize = np.dtype(out_dtype).itemsize
    flops = 2 * N * H * W * (Cin * width + 9 * width * width + width * Cout)
    bytes_accessed = ((xh.size + halo.size) * 4
                      + N * H * W * Cout * out_itemsize
                      + (w1.size + w2.size + w3.size) * 2
                      + (b1.size + b2.size + b3.size) * 4)

    grid_spec = pltpu.PrefetchScalarGridSpec(
        num_scalar_prefetch=0,
        grid=(N, n_h),
        in_specs=[
            pl.BlockSpec((1, tile_h, W, Cin), lambda n, i: (n, i, 0, 0)),
            pl.BlockSpec((1, 2, W, Cin), lambda n, i: (n, i, 0, 0)),
            pl.BlockSpec((Cin, width), lambda n, i: (0, 0)),
            pl.BlockSpec((1, width), lambda n, i: (0, 0)),
            pl.BlockSpec((3, 3 * width, width), lambda n, i: (0, 0, 0)),
            pl.BlockSpec((1, width), lambda n, i: (0, 0)),
            pl.BlockSpec((width, Cout), lambda n, i: (0, 0)),
            pl.BlockSpec((1, Cout), lambda n, i: (0, 0)),
        ],
        out_specs=pl.BlockSpec((1, tile_h, W, Cout), lambda n, i: (n, i, 0, 0)),
    )

    out_nhwc = pl.pallas_call(
        _bottleneck_kernel,
        out_shape=jax.ShapeDtypeStruct((N, H, W, Cout), out_dtype),
        grid_spec=grid_spec,
        compiler_params=pltpu.CompilerParams(
            dimension_semantics=("parallel", "parallel"),   # megacore-friendly
            vmem_limit_bytes=int(vmem_limit),
        ),
        cost_estimate=pl.CostEstimate(flops=int(flops), transcendentals=0,
                                      bytes_accessed=int(bytes_accessed)),
    )(xh, halo, w1, b1, w2, b2, w3, b3)

    return out_nhwc if nhwc_io else jnp.transpose(out_nhwc, (0, 3, 1, 2))


def reference_forward(x, p, eps=1e-5):
    """Pure-JAX NCHW reference (eval-mode BN), plain f32 module semantics."""
    def bn(o, g, b, m, v):
        g = g[None, :, None, None]; b = b[None, :, None, None]
        m = m[None, :, None, None]; v = v[None, :, None, None]
        return g * (o - m) / jnp.sqrt(v + eps) + b

    dn = ("NCHW", "OIHW", "NCHW")
    o = lax.conv_general_dilated(x, p["conv1_w"], (1, 1), "VALID", dimension_numbers=dn)
    o = jax.nn.relu(bn(o, p["bn1_g"], p["bn1_b"], p["bn1_m"], p["bn1_v"]))
    o = lax.conv_general_dilated(o, p["conv2_w"], (1, 1), ((1, 1), (1, 1)), dimension_numbers=dn)
    o = jax.nn.relu(bn(o, p["bn2_g"], p["bn2_b"], p["bn2_m"], p["bn2_v"]))
    o = lax.conv_general_dilated(o, p["conv3_w"], (1, 1), "VALID", dimension_numbers=dn)
    o = bn(o, p["bn3_g"], p["bn3_b"], p["bn3_m"], p["bn3_v"])
    return jax.nn.relu(o + x)


def mimic_reference(x_nchw, p, eps=1e-5):
    """NHWC reference mirroring the kernel's folded-BN + bf16-input / f32-accum
    matmuls, for a tight numerical check of the fused kernel."""
    f32, bf16 = jnp.float32, jnp.bfloat16
    q = lambda a: a.astype(bf16).astype(f32)
    x = jnp.transpose(x_nchw, (0, 2, 3, 1)).astype(f32)
    s1, b1 = _fold_bn(p["bn1_g"], p["bn1_b"], p["bn1_m"], p["bn1_v"], eps)
    s2, b2 = _fold_bn(p["bn2_g"], p["bn2_b"], p["bn2_m"], p["bn2_v"], eps)
    s3, b3 = _fold_bn(p["bn3_g"], p["bn3_b"], p["bn3_m"], p["bn3_v"], eps)
    w1 = q(jnp.transpose(p["conv1_w"][:, :, 0, 0] * s1[:, None], (1, 0)))[None, None]
    w2 = q(jnp.transpose(p["conv2_w"] * s2[:, None, None, None], (2, 3, 1, 0)))
    w3 = q(jnp.transpose(p["conv3_w"][:, :, 0, 0] * s3[:, None], (1, 0)))[None, None]
    dn = ("NHWC", "HWIO", "NHWC")
    h = lax.conv_general_dilated(q(x), w1, (1, 1), "VALID", dimension_numbers=dn)
    h = jax.nn.relu(h + b1)
    h = lax.conv_general_dilated(q(h), w2, (1, 1), ((1, 1), (1, 1)), dimension_numbers=dn)
    h = jax.nn.relu(h + b2)
    h = lax.conv_general_dilated(q(h), w3, (1, 1), "VALID", dimension_numbers=dn)
    h = jax.nn.relu(h + b3 + x)
    return jnp.transpose(h, (0, 3, 1, 2))


def make_params(key, inplanes, planes, base_width=64, groups=1, expansion=2):
    width = int(planes * (base_width / 64.0)) * groups
    cout = planes * expansion
    ks = jax.random.split(key, 12)
    f32 = jnp.float32
    return {
        "conv1_w": 0.3 * jax.random.normal(ks[0], (width, inplanes, 1, 1), f32),
        "conv2_w": 0.3 * jax.random.normal(ks[1], (width, width, 3, 3), f32),
        "conv3_w": 0.3 * jax.random.normal(ks[2], (cout, width, 1, 1), f32),
        "bn1_g": 1.0 + 0.1 * jax.random.normal(ks[3], (width,), f32),
        "bn1_b": 0.1 * jax.random.normal(ks[4], (width,), f32),
        "bn1_m": 0.1 * jax.random.normal(ks[5], (width,), f32),
        "bn1_v": 1.0 + 0.1 * jax.random.uniform(ks[6], (width,), f32),
        "bn2_g": 1.0 + 0.1 * jax.random.normal(ks[7], (width,), f32),
        "bn2_b": 0.1 * jax.random.normal(ks[8], (width,), f32),
        "bn2_m": 0.1 * jax.random.normal(ks[9], (width,), f32),
        "bn2_v": 1.0 + 0.1 * jax.random.uniform(ks[10], (width,), f32),
        "bn3_g": 1.0 + 0.1 * jax.random.normal(ks[11], (cout,), f32),
        "bn3_b": jnp.zeros((cout,), f32),
        "bn3_m": jnp.zeros((cout,), f32),
        "bn3_v": jnp.ones((cout,), f32),
    }


if __name__ == "__main__":
    key = jax.random.PRNGKey(0)
    k_x, k_p = jax.random.split(key)

    # batch=2, inplanes=4, planes=2 (=> width=2, out channels=4), 16x16 spatial,
    # stride=1, downsample=None. tile_h=8 => grid (N=2, n_h=2) so the halo /
    # boundary-masking paths are exercised across H tiles.
    N, inplanes, planes, H, W = 2, 4, 2, 16, 16
    x = jax.random.normal(k_x, (N, inplanes, H, W), jnp.float32)
    params = make_params(k_p, inplanes, planes)

    fwd = jax.jit(functools.partial(bottleneck_forward, tile_h=8))
    out = jax.block_until_ready(fwd(x, params))
    assert out.shape == (N, planes * 2, H, W), out.shape

    ref_tight = mimic_reference(x, params)     # same bf16/f32 recipe as kernel
    ref_f32 = reference_forward(x, params)     # plain f32 eval-mode module
    err_tight = float(jnp.max(jnp.abs(out - ref_tight)))
    err_f32 = float(jnp.max(jnp.abs(out - ref_f32)))
    assert err_tight < 5e-3, err_tight
    assert err_f32 < 1e-1, err_f32

    print("KERNEL_OK")
</pallas_src>

<mosaic_0001>
module attributes {stable_mosaic.version = 11 : i64} {
  func.func @_bottleneck_kernel(%arg0: i32, %arg1: i32, %arg2: memref<1x8x16x4xf32, #tpu.memory_space<vmem>>, %arg3: memref<1x2x16x4xf32, #tpu.memory_space<vmem>>, %arg4: memref<4x2xbf16, #tpu.memory_space<vmem>>, %arg5: memref<1x2xf32, #tpu.memory_space<vmem>>, %arg6: memref<3x6x2xbf16, #tpu.memory_space<vmem>>, %arg7: memref<1x2xf32, #tpu.memory_space<vmem>>, %arg8: memref<2x4xbf16, #tpu.memory_space<vmem>>, %arg9: memref<1x4xf32, #tpu.memory_space<vmem>>, %arg10: memref<1x8x16x4xf32, #tpu.memory_space<vmem>>) attributes {dimension_semantics = [#tpu.dimension_semantics<parallel>, #tpu.dimension_semantics<parallel>], iteration_bounds = array<i64: 2, 2>, scalar_prefetch = 0 : i64, scratch_operands = 0 : i64, tpu.core_type = #tpu.core_type<tc>, window_params = [{transform_indices = @transform_0, window_bounds = array<i64: 1, 8, 16, 4>}, {transform_indices = @transform_1, window_bounds = array<i64: 1, 2, 16, 4>}, {pipeline_mode = #tpu.pipeline_mode<synchronous>, transform_indices = @transform_2, window_bounds = array<i64: 4, 2>}, {pipeline_mode = #tpu.pipeline_mode<synchronous>, transform_indices = @transform_3, window_bounds = array<i64: 1, 2>}, {pipeline_mode = #tpu.pipeline_mode<synchronous>, transform_indices = @transform_4, window_bounds = array<i64: 3, 6, 2>}, {pipeline_mode = #tpu.pipeline_mode<synchronous>, transform_indices = @transform_5, window_bounds = array<i64: 1, 2>}, {pipeline_mode = #tpu.pipeline_mode<synchronous>, transform_indices = @transform_6, window_bounds = array<i64: 2, 4>}, {pipeline_mode = #tpu.pipeline_mode<synchronous>, transform_indices = @transform_7, window_bounds = array<i64: 1, 4>}, {transform_indices = @transform_8, window_bounds = array<i64: 1, 8, 16, 4>}]} {
    %c0 = arith.constant 0 : index
    %c0_0 = arith.constant 0 : index
    %c0_1 = arith.constant 0 : index
    %c0_2 = arith.constant 0 : index
    %0 = vector.load %arg2[%c0, %c0_0, %c0_1, %c0_2] : memref<1x8x16x4xf32, #tpu.memory_space<vmem>>, vector<1x8x16x4xf32>
    %1 = vector.shape_cast %0 : vector<1x8x16x4xf32> to vector<128x4xf32>
    %c0_3 = arith.constant 0 : index
    %c0_4 = arith.constant 0 : index
    %c0_5 = arith.constant 0 : index
    %c0_6 = arith.constant 0 : index
    %2 = vector.load %arg3[%c0_3, %c0_4, %c0_5, %c0_6] : memref<1x2x16x4xf32, #tpu.memory_space<vmem>>, vector<1x2x16x4xf32>
    %3 = vector.shape_cast %2 : vector<1x2x16x4xf32> to vector<32x4xf32>
    %4 = arith.truncf %1 : vector<128x4xf32> to vector<128x4xbf16>
    %c0_7 = arith.constant 0 : index
    %c0_8 = arith.constant 0 : index
    %5 = vector.load %arg4[%c0_7, %c0_8] : memref<4x2xbf16, #tpu.memory_space<vmem>>, vector<4x2xbf16>
    %cst = arith.constant dense<0.000000e+00> : vector<128x2xf32>
    %6 = tpu.matmul %4, %5, %cst {dimension_numbers = #tpu.dot_dimension_numbers<[1], [0], [0], [1], [0, 0, 1, 1], [], []>} : vector<128x4xbf16>, vector<4x2xbf16>, vector<128x2xf32> -> vector<128x2xf32>
    %c0_9 = arith.constant 0 : index
    %c0_10 = arith.constant 0 : index
    %7 = vector.load %arg5[%c0_9, %c0_10] : memref<1x2xf32, #tpu.memory_space<vmem>>, vector<1x2xf32>
    %8 = vector.broadcast %7 : vector<1x2xf32> to vector<128x2xf32>
    %9 = arith.addf %6, %8 : vector<128x2xf32>
    %cst_11 = arith.constant 0.000000e+00 : f32
    %10 = vector.broadcast %cst_11 : f32 to vector<128x2xf32>
    %11 = arith.maximumf %9, %10 : vector<128x2xf32>
    %12 = arith.truncf %3 : vector<32x4xf32> to vector<32x4xbf16>
    %c0_12 = arith.constant 0 : index
    %c0_13 = arith.constant 0 : index
    %13 = vector.load %arg4[%c0_12, %c0_13] : memref<4x2xbf16, #tpu.memory_space<vmem>>, vector<4x2xbf16>
    %cst_14 = arith.constant dense<0.000000e+00> : vector<32x2xf32>
    %14 = tpu.matmul %12, %13, %cst_14 {dimension_numbers = #tpu.dot_dimension_numbers<[1], [0], [0], [1], [0, 0, 1, 1], [], []>} : vector<32x4xbf16>, vector<4x2xbf16>, vector<32x2xf32> -> vector<32x2xf32>
    %c0_15 = arith.constant 0 : index
    %c0_16 = arith.constant 0 : index
    %15 = vector.load %arg5[%c0_15, %c0_16] : memref<1x2xf32, #tpu.memory_space<vmem>>, vector<1x2xf32>
    %16 = vector.broadcast %15 : vector<1x2xf32> to vector<32x2xf32>
    %17 = arith.addf %14, %16 : vector<32x2xf32>
    %cst_17 = arith.constant 0.000000e+00 : f32
    %18 = vector.broadcast %cst_17 : f32 to vector<32x2xf32>
    %19 = arith.maximumf %17, %18 : vector<32x2xf32>
    %c0_i32 = arith.constant 0 : i32
    %20 = arith.cmpi eq, %arg1, %c0_i32 : i32
    %21 = vector.extract_strided_slice %19 {offsets = [0, 0], sizes = [16, 2], strides = [1, 1]} : vector<32x2xf32> to vector<16x2xf32>
    %cst_18 = arith.constant 0.000000e+00 : f32
    %22 = vector.broadcast %cst_18 : f32 to vector<16x2xf32>
    %23 = arith.select %20, %22, %21 : vector<16x2xf32>
    %c1_i32 = arith.constant 1 : i32
    %24 = arith.cmpi eq, %arg1, %c1_i32 : i32
    %25 = vector.extract_strided_slice %19 {offsets = [16, 0], sizes = [16, 2], strides = [1, 1]} : vector<32x2xf32> to vector<16x2xf32>
    %cst_19 = arith.constant 0.000000e+00 : f32
    %26 = vector.broadcast %cst_19 : f32 to vector<16x2xf32>
    %27 = arith.select %24, %26, %25 : vector<16x2xf32>
    %28 = tpu.concatenate %23, %11, %27 in 0 : vector<16x2xf32>, vector<128x2xf32>, vector<16x2xf32> -> vector<160x2xf32>
    %29 = tpu.iota {dimensions = array<i32: 1>} : vector<10x16x1xi32>
    %30 = vector.shape_cast %29 : vector<10x16x1xi32> to vector<160x1xi32>
    %cst_20 = arith.constant 0.000000e+00 : f32
    %31 = vector.broadcast %cst_20 : f32 to vector<1x2xf32>
    %c0_i32_21 = arith.constant 0 : i32
    %32 = vector.broadcast %c0_i32_21 : i32 to vector<160x1xi32>
    %33 = arith.cmpi eq, %30, %32 : vector<160x1xi32>
    %34 = vector.extract_strided_slice %28 {offsets = [0, 0], sizes = [159, 2], strides = [1, 1]} : vector<160x2xf32> to vector<159x2xf32>
    %35 = tpu.concatenate %31, %34 in 0 : vector<1x2xf32>, vector<159x2xf32> -> vector<160x2xf32>
    %cst_22 = arith.constant 0.000000e+00 : f32
    %36 = vector.shape_cast %33 : vector<160x1xi1> to vector<160x1xi1>
    %37 = vector.broadcast %36 : vector<160x1xi1> to vector<160x2xi1>
    %38 = vector.broadcast %cst_22 : f32 to vector<160x2xf32>
    %39 = arith.select %37, %38, %35 : vector<160x2xi1>, vector<160x2xf32>
    %c15_i32 = arith.constant 15 : i32
    %40 = vector.broadcast %c15_i32 : i32 to vector<160x1xi32>
    %41 = arith.cmpi eq, %30, %40 : vector<160x1xi32>
    %42 = vector.extract_strided_slice %28 {offsets = [1, 0], sizes = [159, 2], strides = [1, 1]} : vector<160x2xf32> to vector<159x2xf32>
    %43 = tpu.concatenate %42, %31 in 0 : vector<159x2xf32>, vector<1x2xf32> -> vector<160x2xf32>
    %cst_23 = arith.constant 0.000000e+00 : f32
    %44 = vector.shape_cast %41 : vector<160x1xi1> to vector<160x1xi1>
    %45 = vector.broadcast %44 : vector<160x1xi1> to vector<160x2xi1>
    %46 = vector.broadcast %cst_23 : f32 to vector<160x2xf32>
    %47 = arith.select %45, %46, %43 : vector<160x2xi1>, vector<160x2xf32>
    %48 = tpu.concatenate %39, %28, %47 in 1 : vector<160x2xf32>, vector<160x2xf32>, vector<160x2xf32> -> vector<160x6xf32>
    %49 = arith.truncf %48 : vector<160x6xf32> to vector<160x6xbf16>
    %50 = vector.extract_strided_slice %49 {offsets = [0, 0], sizes = [128, 6], strides = [1, 1]} : vector<160x6xbf16> to vector<128x6xbf16>
    %c0_24 = arith.constant 0 : index
    %c0_25 = arith.constant 0 : index
    %c0_26 = arith.constant 0 : index
    %51 = vector.load %arg6[%c0_24, %c0_25, %c0_26] : memref<3x6x2xbf16, #tpu.memory_space<vmem>>, vector<1x6x2xbf16>
    %52 = vector.shape_cast %51 : vector<1x6x2xbf16> to vector<6x2xbf16>
    %cst_27 = arith.constant dense<0.000000e+00> : vector<128x2xf32>
    %53 = tpu.matmul %50, %52, %cst_27 {dimension_numbers = #tpu.dot_dimension_numbers<[1], [0], [0], [1], [0, 0, 1, 1], [], []>} : vector<128x6xbf16>, vector<6x2xbf16>, vector<128x2xf32> -> vector<128x2xf32>
    %54 = vector.extract_strided_slice %49 {offsets = [16, 0], sizes = [128, 6], strides = [1, 1]} : vector<160x6xbf16> to vector<128x6xbf16>
    %c1 = arith.constant 1 : index
    %c0_28 = arith.constant 0 : index
    %c0_29 = arith.constant 0 : index
    %55 = vector.load %arg6[%c1, %c0_28, %c0_29] : memref<3x6x2xbf16, #tpu.memory_space<vmem>>, vector<1x6x2xbf16>
    %56 = vector.shape_cast %55 : vector<1x6x2xbf16> to vector<6x2xbf16>
    %cst_30 = arith.constant dense<0.000000e+00> : vector<128x2xf32>
    %57 = tpu.matmul %54, %56, %cst_30 {dimension_numbers = #tpu.dot_dimension_numbers<[1], [0], [0], [1], [0, 0, 1, 1], [], []>} : vector<128x6xbf16>, vector<6x2xbf16>, vector<128x2xf32> -> vector<128x2xf32>
    %58 = arith.addf %53, %57 : vector<128x2xf32>
    %59 = vector.extract_strided_slice %49 {offsets = [32, 0], sizes = [128, 6], strides = [1, 1]} : vector<160x6xbf16> to vector<128x6xbf16>
    %c2 = arith.constant 2 : index
    %c0_31 = arith.constant 0 : index
    %c0_32 = arith.constant 0 : index
    %60 = vector.load %arg6[%c2, %c0_31, %c0_32] : memref<3x6x2xbf16, #tpu.memory_space<vmem>>, vector<1x6x2xbf16>
    %61 = vector.shape_cast %60 : vector<1x6x2xbf16> to vector<6x2xbf16>
    %cst_33 = arith.constant dense<0.000000e+00> : vector<128x2xf32>
    %62 = tpu.matmul %59, %61, %cst_33 {dimension_numbers = #tpu.dot_dimension_numbers<[1], [0], [0], [1], [0, 0, 1, 1], [], []>} : vector<128x6xbf16>, vector<6x2xbf16>, vector<128x2xf32> -> vector<128x2xf32>
    %63 = arith.addf %58, %62 : vector<128x2xf32>
    %c0_34 = arith.constant 0 : index
    %c0_35 = arith.constant 0 : index
    %64 = vector.load %arg7[%c0_34, %c0_35] : memref<1x2xf32, #tpu.memory_space<vmem>>, vector<1x2xf32>
    %65 = vector.broadcast %64 : vector<1x2xf32> to vector<128x2xf32>
    %66 = arith.addf %63, %65 : vector<128x2xf32>
    %cst_36 = arith.constant 0.000000e+00 : f32
    %67 = vector.broadcast %cst_36 : f32 to vector<128x2xf32>
    %68 = arith.maximumf %66, %67 : vector<128x2xf32>
    %69 = arith.truncf %68 : vector<128x2xf32> to vector<128x2xbf16>
    %c0_37 = arith.constant 0 : index
    %c0_38 = arith.constant 0 : index
    %70 = vector.load %arg8[%c0_37, %c0_38] : memref<2x4xbf16, #tpu.memory_space<vmem>>, vector<2x4xbf16>
    %cst_39 = arith.constant dense<0.000000e+00> : vector<128x4xf32>
    %71 = tpu.matmul %69, %70, %cst_39 {dimension_numbers = #tpu.dot_dimension_numbers<[1], [0], [0], [1], [0, 0, 1, 1], [], []>} : vector<128x2xbf16>, vector<2x4xbf16>, vector<128x4xf32> -> vector<128x4xf32>
    %c0_40 = arith.constant 0 : index
    %c0_41 = arith.constant 0 : index
    %72 = vector.load %arg9[%c0_40, %c0_41] : memref<1x4xf32, #tpu.memory_space<vmem>>, vector<1x4xf32>
    %73 = vector.broadcast %72 : vector<1x4xf32> to vector<128x4xf32>
    %74 = arith.addf %71, %73 : vector<128x4xf32>
    %75 = arith.addf %74, %1 : vector<128x4xf32>
    %cst_42 = arith.constant 0.000000e+00 : f32
    %76 = vector.broadcast %cst_42 : f32 to vector<128x4xf32>
    %77 = arith.maximumf %75, %76 : vector<128x4xf32>
    %78 = vector.shape_cast %77 : vector<128x4xf32> to vector<1x8x16x4xf32>
    %c0_43 = arith.constant 0 : index
    %c0_44 = arith.constant 0 : index
    %c0_45 = arith.constant 0 : index
    %c0_46 = arith.constant 0 : index
    %79 = vector.load %arg10[%c0_43, %c0_44, %c0_45, %c0_46] : memref<1x8x16x4xf32, #tpu.memory_space<vmem>>, vector<1x8x16x4xf32>
    tpu.vector_store %arg10[%c0_43, %c0_44, %c0_45, %c0_46], %78 {strides = array<i32>} : memref<1x8x16x4xf32, #tpu.memory_space<vmem>>, vector<1x8x16x4xf32>,
    return
  }
  func.func @transform_0(%arg0: i32, %arg1: i32) -> (i32, i32, i32, i32) {
    %c0_i32 = arith.constant 0 : i32
    %c0_i32_0 = arith.constant 0 : i32
    %c0_i32_1 = arith.constant 0 : i32
    return %arg0, %arg1, %c0_i32, %c0_i32_0 : i32, i32, i32, i32
  }
  func.func @transform_1(%arg0: i32, %arg1: i32) -> (i32, i32, i32, i32) {
    %c0_i32 = arith.constant 0 : i32
    %c0_i32_0 = arith.constant 0 : i32
    %c0_i32_1 = arith.constant 0 : i32
    return %arg0, %arg1, %c0_i32, %c0_i32_0 : i32, i32, i32, i32
  }
  func.func @transform_2(%arg0: i32, %arg1: i32) -> (i32, i32) {
    %c0_i32 = arith.constant 0 : i32
    %c0_i32_0 = arith.constant 0 : i32
    %c0_i32_1 = arith.constant 0 : i32
    return %c0_i32, %c0_i32_0 : i32, i32
  }
  func.func @transform_3(%arg0: i32, %arg1: i32) -> (i32, i32) {
    %c0_i32 = arith.constant 0 : i32
    %c0_i32_0 = arith.constant 0 : i32
    %c0_i32_1 = arith.constant 0 : i32
    return %c0_i32, %c0_i32_0 : i32, i32
  }
  func.func @transform_4(%arg0: i32, %arg1: i32) -> (i32, i32, i32) {
    %c0_i32 = arith.constant 0 : i32
    %c0_i32_0 = arith.constant 0 : i32
    %c0_i32_1 = arith.constant 0 : i32
    %c0_i32_2 = arith.constant 0 : i32
    return %c0_i32, %c0_i32_0, %c0_i32_1 : i32, i32, i32
  }
  func.func @transform_5(%arg0: i32, %arg1: i32) -> (i32, i32) {
    %c0_i32 = arith.constant 0 : i32
    %c0_i32_0 = arith.constant 0 : i32
    %c0_i32_1 = arith.constant 0 : i32
    return %c0_i32, %c0_i32_0 : i32, i32
  }
  func.func @transform_6(%arg0: i32, %arg1: i32) -> (i32, i32) {
    %c0_i32 = arith.constant 0 : i32
    %c0_i32_0 = arith.constant 0 : i32
    %c0_i32_1 = arith.constant 0 : i32
    return %c0_i32, %c0_i32_0 : i32, i32
  }
  func.func @transform_7(%arg0: i32, %arg1: i32) -> (i32, i32) {
    %c0_i32 = arith.constant 0 : i32
    %c0_i32_0 = arith.constant 0 : i32
    %c0_i32_1 = arith.constant 0 : i32
    return %c0_i32, %c0_i32_0 : i32, i32
  }
  func.func @transform_8(%arg0: i32, %arg1: i32) -> (i32, i32, i32, i32) {
    %c0_i32 = arith.constant 0 : i32
    %c0_i32_0 = arith.constant 0 : i32
    %c0_i32_1 = arith.constant 0 : i32
    return %arg0, %arg1, %c0_i32, %c0_i32_0 : i32, i32, i32, i32
  }
}

</mosaic_0001>

<bundles_post_ra>
// kernel: bottleneck_forward.1
= control target key start
LH: loop header
LB: loop body
LE: loop exit
PB: predicated region body
PF: predicated region fallthrough
CT: control target
= control target key end

     0   :  { %s2193_s27 = smov 0   ;;  %s2195_s28 = smov 0   ;;  %s2902_s0 = inlined_call_operand.vmem [shape: f32[2,16,16,4], index: 0, kind: input, shape index: {}]   ;;  %s2903_s1 = inlined_call_operand.vmem [shape: f32[2,4,16,4], index: 1, kind: input, shape index: {}]   ;;  %s2904_s2 = inlined_call_operand.vmem [shape: bf16[4,2], index: 2, kind: input, shape index: {}]   ;;  %s2905_s3 = inlined_call_operand.vmem [shape: f32[1,2], index: 3, kind: input, shape index: {}]   ;;  %s2906_s4 = inlined_call_operand.vmem [shape: bf16[3,6,2], index: 4, kind: input, shape index: {}]   ;;  %s2907_s5 = inlined_call_operand.vmem [shape: f32[1,2], index: 5, kind: input, shape index: {}]   ;;  %s2908_s6 = inlined_call_operand.vmem [shape: bf16[2,4], index: 6, kind: input, shape index: {}]   ;;  %s2909_s7 = inlined_call_operand.vmem [shape: f32[1,4], index: 7, kind: input, shape index: {}]   ;;  %s2910_s8 = inlined_call_operand.vmem [shape: f32[2,16,16,4], index: 8, kind: output, shape index: {}]  }
   0x1   :  { %s2197_s29 = smov 0   ;;  %s2199_s30 = smov 0  }
   0x2   :  { %s2201_s9 = smov 0  }
   0x3 LB: > { %s27_s10 = sadd.s32 1, %s2136_s29  ;;  %s30_s11 = sadd.s32 1, %s2140_s30  ;;  %s2144_s9 = sphi %s2201_s9, %s18_s9   ;;  %s2140_s30 = sphi %s2199_s30, %s2918_s30   ;;  %s2136_s29 = sphi %s2197_s29, %s2917_s29   ;;  %s2132_s28 = sphi %s2195_s28, %s2916_s28   ;;  %s2128_s27 = sphi %s2193_s27, %s2915_s27  }
   0x4   : > { %p28_p0 = scmp.ge.s32.totalorder %s27_s10, 2  ;;  %p1733_p1 = scmp.ge.s32.totalorder %s2144_s9, 1 }
   0x5   : > { %p302_p2 = scmp.lt.s32.totalorder %s2144_s9, 5 }
   0x6   : > { %s2920_s10 = smov (%p28_p0, %s27_s10), 0  ;;  %s2922_s11 = smov (!%p28_p0, %s30_s11), %s2140_s30 }
   0x7   : > { %p303_p3 = pnand %p1733_p1, %p302_p2  ;;  %p32_p4 = scmp.ge.s32.totalorder %s2922_s11, 2 }
   0x8   : > { %s1734_s14 = sshll.u32 (!%p303_p3), %s2128_s27, 3  ;;  %p357_p5 = scmp.lt.s32.totalorder (!%p303_p3), %s2132_s28, 1 }
   0x9   : > { %s2924_s11 = smov (%p32_p4, %s2922_s11), 0  ;;  %306 = sbr.rel (%p303_p3) target bundleno = 829 (0x33d), region = 52 }
   0xa   : > { %p359_p6 = scmp.lt.s32.totalorder (!%p303_p3), %s1734_s14, 15  ;;  %s1738_s15 = sshll.u32 (!%p303_p3), %s2128_s27, 1 }
   0xb   : > { %p370_p7 = scmp.lt.s32.totalorder (!%p303_p3), %s1738_s15, 3  ;;  %p629_p8 = scmp.eq.s32.totalorder (!%p303_p3), %s2128_s27, 0 }
   0xc   : > { %p635_p9 = scmp.eq.s32.totalorder (!%p303_p3), %s2128_s27, 1  ;;  %s2147_s20 = smov (!%p303_p3), 4  }
   0xe   : > { %v418_v0 = vld [vmem:[%s2904_s2] sm:$0x3]  ;;  %vm451_vm0 = vcmask 1041408   ;;  %s2926_s28 = smov (!%p357_p5, %s2132_s28), 1  ;;  %s2928_s14 = smov (!%p359_p6, %s1734_s14), 15  ;;  %vm426_vm1 = vcmask 31744   ;;  %v641_v34 = vlaneseq }
   0xf   : > { %1941 = vmatprep.subr.msk.bf16.mxu0 %vm451_vm0, %v418_v0  ;;  %1942 = vmatprep.subr.msk.bf16.mxu1 %vm451_vm0, %v418_v0  ;;  %v453_v1 = vsel %vm451_vm0, %v418_v0, 0  ;;  %s1736_s16 = sshll.u32 %s2926_s28, 5  ;;  %s1735_s17 = sshll.u32 %s2928_s14, 1  ;;  %v2276_v33 = vld [vmem:[%s2905_s3] ss:$0 sm:$0xff]  ;;  %vm666_vm2 = vcmask 1040384  }
  0x10   : > { %1844 = vmatpush3.bf16.msra.mxu0 %v453_v1  ;;  %1940 = vmatpush3.bf16.msra.mxu1 %v453_v1  ;;  %s2233_s18 = sadd.s32 %s1736_s16, %s1735_s17  ;;  %s1740_s23 = sshll.u32 %s2926_s28, 3  ;;  %v2282_v41 = vshrl.u32 %v641_v34, 7  ;;  %vm753_vm6 = vcmask 1046528   ;;  %vm1057_vm8 = vcmask 1042432   ;;  %vm978_vm9 = vcmask 15360  }
  0x11   : > { %1943 = vmatprep.subr.msk.bf16.mxu1 %vm451_vm0, %v418_v0  ;;  %s1737_s19 = sshll.u32 %s2233_s18, 3  ;;  %s2930_s15 = smov (!%p370_p7, %s1738_s15), 3  ;;  %vm1032_vm10 = vcmask 48128  }
  0x12   : > { %s2241_s22 = scalar_lea.vmem %s2902_s0, %s1737_s19  ;;  %s1739_s24 = sshll.u32 %s2930_s15, 1  ;;  %v2295_v53 = vadd.s32 8, %v2282_v41  ;;  %vm644_vm4 = vcmp.eq.s32.totalorder %v2282_v41, 0 }
  0x13   : > { %v390_v2 = vld [vmem:[%s2241_s22] sm:$0xff]  ;;  %v391_v3 = vld [vmem:[%s2241_s22 + $0x8] sm:$0xff]  ;;  %v392_v7 = vld [vmem:[%s2241_s22 + $0x10] sm:$0xff]  ;;  %s374_s25 = sadd.s32 %s1740_s23, %s1739_s24  ;;  %s2146_s17 = smov 2  }
  0x14   : > { %v402_v4 = vld [vmem:[%s2241_s22 + $0x60] sm:$0xff]  ;;  %v410_v5 = vpack.c.bf16 %v391_v3, %v390_v2  ;;  %v403_v6 = vld [vmem:[%s2241_s22 + $0x68] sm:$0xff]  ;;  %v393_v8 = vld [vmem:[%s2241_s22 + $0x18] sm:$0xff]  ;;  %s1741_s26 = sshll.u32 %s374_s25, 3  ;;  %vm752_vm5 = vcmp.eq.s32.totalorder %v2295_v53, 15  ;;  %s2824_s21 = scalar_lea.vmem %s2910_s8, %s1737_s19 }
  0x15   : > { %v416_v9 = vpack.c.bf16 %v403_v6, %v402_v4  ;;  %v411_v10 = vpack.c.bf16 %v393_v8, %v392_v7  ;;  %v404_v11 = vld [vmem:[%s2241_s22 + $0x70] sm:$0xff]  ;;  %v405_v12 = vld [vmem:[%s2241_s22 + $0x78] sm:$0xff]  ;;  %v394_v13 = vld [vmem:[%s2241_s22 + $0x20] sm:$0xff]  ;;  %s376_s13 = scalar_lea.vmem %s2903_s1, %s1741_s26 }
  0x16   : > { %1845 = vmatprep.mubr.msk.bf16.mxu0 %vm426_vm1, %v410_v5  ;;  %v417_v14 = vpack.c.bf16 %v405_v12, %v404_v11  ;;  %v395_v15 = vld [vmem:[%s2241_s22 + $0x28] sm:$0xff]  ;;  %v396_v17 = vld [vmem:[%s2241_s22 + $0x30] sm:$0xff]  ;;  %v397_v18 = vld [vmem:[%s2241_s22 + $0x38] sm:$0xff]  ;;  %s630_s16 = scalar_select %p629_p8, 1, 0 }
  0x17   : > { %1857 = vmatprep.mubr.msk.bf16.mxu1 %vm426_vm1, %v416_v9  ;;  %1846 = vmatmul.mubr.msk.bf16.vlgmr.msra.gmra.mxu0 %vm426_vm1, %v411_v10  ;;  %v412_v16 = vpack.c.bf16 %v395_v15, %v394_v13  ;;  %v398_v19 = vld [vmem:[%s2241_s22 + $0x40] sm:$0xff]  ;;  %v399_v20 = vld [vmem:[%s2241_s22 + $0x48] sm:$0xff]  ;;  %v408_v23 = vld [vmem:[%s376_s13 + $0x10] sm:$0xff]  ;;  %v413_v26 = vpack.c.bf16 %v397_v18, %v396_v17  ;;  %s2290_s27 = scalar_select %p635_p9, 1, 0 }
  0x18   : > { %1858 = vmatmul.mubr.msk.bf16.vlgmr.msra.gmra.mxu1 %vm426_vm1, %v417_v14  ;;  %v406_v21 = vld [vmem:[%s376_s13] sm:$0xff]  ;;  %v407_v22 = vld [vmem:[%s376_s13 + $0x8] sm:$0xff]  ;;  %v409_v25 = vld [vmem:[%s376_s13 + $0x18] sm:$0xff]  ;;  %v414_v28 = vpack.c.bf16 %v399_v20, %v398_v19  ;;  %v631_v52 = vstv %s630_s16 }
  0x19   : > { %1862 = vmatpush3.bf16.msra.mxu1 %v453_v1  ;;  %1849 = vmatprep.mubr.msk.bf16.mxu0 %vm426_vm1, %v412_v16  ;;  %v568_v24 = vpack.c.bf16 %v407_v22, %v406_v21  ;;  %v569_v27 = vpack.c.bf16 %v409_v25, %v408_v23  ;;  %v400_v29 = vld [vmem:[%s2241_s22 + $0x50] sm:$0xff]  ;;  %v401_v30 = vld [vmem:[%s2241_s22 + $0x58] sm:$0xff]  ;;  %v637_v62 = vstv %s2290_s27  ;;  %vm2308_vm3 = vcmp.eq.s32.totalorder %v631_v52, 1 }
  0x1a   : > { %v415_v31 = vpack.c.bf16 %v401_v30, %v400_v29  ;;  %vm2332_vm7 = vcmp.eq.s32.totalorder %v637_v62, 1 }
  0x1b   : > { %1863 = vmatprep.mubr.msk.bf16.mxu1 %vm426_vm1, %v568_v24 }
  0x1f   : > { %1850 = vmatmul.mubr.msk.bf16.gmra.mxu0 %vm426_vm1, %v413_v26 }
  0x20   : > { %1864 = vmatmul.mubr.msk.bf16.vlgmr.msra.gmra.mxu1 %vm426_vm1, %v569_v27  ;;  %1853 = vmatprep.mubr.msk.bf16.mxu0 %vm426_vm1, %v414_v28 }
  0x27   : > { %1854 = vmatmul.mubr.msk.bf16.gmra.mxu0 %vm426_vm1, %v415_v31 }
  0xd7   : > { %v1847_v32 = vpop.f32.mrf.mxu0 }
  0xd8   : > { %v1859_v35 = vpop.f32.mrf.mxu1  ;;  %v498_v37 = vadd.f32 %v1847_v32, %v2276_v33 }
  0xd9   : > { %v489_v36 = vpop.f32.mrf.mxu0  ;;  %v546_v39 = vadd.f32 %v1859_v35, %v2276_v33 }
  0xda   : > { %v537_v38 = vpop.f32.mrf.mxu1  ;;  %v490_v42 = vadd.f32 %v2276_v33, %v489_v36  ;;  %v2286_v46 = vmax.f32 %v498_v37, 0.0 }
  0xdb   : > { %v1848_v40 = vpop.f32.mrf.mxu0  ;;  %v538_v44 = vadd.f32 %v2276_v33, %v537_v38  ;;  %v2292_v50 = vmax.f32 %v546_v39, 0.0 }
  0xdc   : > { %v1860_v43 = vpop.f32.mrf.mxu1  ;;  %v501_v47 = vadd.f32 %v1848_v40, %v2276_v33  ;;  %v2297_v54 = vmax.f32 %v490_v42, 0.0  ;;  %v674_v60 = vrot.slane %v2286_v46, 7  ;;  %v761_v1 = vrot.slane %v2286_v46, 1 }
  0xdd   : > { %v492_v45 = vpop.f32.mrf.mxu0  ;;  %v549_v55 = vadd.f32 %v1860_v43, %v2276_v33  ;;  %v2300_v57 = vmax.f32 %v538_v44, 0.0  ;;  %v698_v2 = vrot.slane %v2292_v50, 7  ;;  %v785_v6 = vrot.slane %v2292_v50, 1 }
  0xde   : > { %v493_v48 = vadd.f32 %v2276_v33, %v492_v45  ;;  %v540_v49 = vpop.f32.mrf.mxu1  ;;  %v2305_v61 = vmax.f32 %v501_v47, 0.0  ;;  %v670_v7 = vrot.slane %v2297_v54, 7  ;;  %v757_v11 = vrot.slane %v2297_v54, 1 }
  0xdf   : > { %v1851_v51 = vpop.f32.mrf.mxu0  ;;  %v2320_v8 = vmax.f32 %v549_v55, 0.0  ;;  %v694_v12 = vrot.slane %v2300_v57, 7  ;;  %v781_v16 = vrot.slane %v2300_v57, 1  ;;  %v541_v19 = vadd.f32 %v2276_v33, %v540_v49 }
  0xe0   : > { %v1865_v56 = vpop.f32.mrf.mxu1  ;;  %v2302_v58 = vmax.f32 %v493_v48, 0.0  ;;  %v514_v9 = vadd.f32 %v1851_v51, %v2276_v33  ;;  %v676_v17 = vrot.slane %v2305_v61, 7  ;;  %v763_v18 = vrot.slane %v2305_v61, 1 }
  0xe1   : > { %v505_v59 = vpop.f32.mrf.mxu0  ;;  %v619_v21 = vadd.f32 %v1865_v56, %v2276_v33  ;;  %v700_v27 = vrot.slane %v2320_v8, 7  ;;  %v787_v37 = vrot.slane %v2320_v8, 1  ;;  %v2356_v39 = vmax.f32 %v541_v19, 0.0 }
  0xe2   : > { %v610_v63 = vpop.f32.mrf.mxu1  ;;  %v506_v3 = vadd.f32 %v2276_v33, %v505_v59  ;;  %v1990_v14 = vpack.i.bf16 %v2302_v58, %v2297_v54  ;;  %v759_v28 = vrot.slane %v2302_v58, 1  ;;  %v2346_v29 = vmax.f32 %v514_v9, 0.0 }
  0xe3   : > { %v611_v4 = vadd.f32 %v2276_v33, %v610_v63  ;;  %v1852_v5 = vpop.f32.mrf.mxu0  ;;  %v672_v38 = vrot.slane %v2302_v58, 7  ;;  %v627_v42 = vmax.f32 %v619_v21, 0.0  ;;  %v1995_v49 = vpack.i.bf16 %v2305_v61, %v2286_v46 }
  0xe4   : > { %v1866_v10 = vpop.f32.mrf.mxu1  ;;  %v2336_v23 = vmax.f32 %v506_v3, 0.0  ;;  %1991 = vrot.lane.b32.xlu0 %v1990_v14, %s2146_s17  ;;  %v517_v31 = vadd.f32 %v1852_v5, %v2276_v33  ;;  %v769_v48 = vrot.slane %v2346_v29, 1  ;;  %v760_v51 = vsel %vm753_vm6, %v757_v11, %v759_v28 }
  0xe5   : > { %v625_v13 = vmax.f32 %v611_v4, 0.0  ;;  %v508_v15 = vpop.f32.mrf.mxu0  ;;  %v622_v32 = vadd.f32 %v1866_v10, %v2276_v33  ;;  %v762_v52 = vsel %vm753_vm6, %v759_v28, %v761_v1  ;;  %v764_v21 = vsel %vm753_vm6, %v761_v1, %v763_v18 }
  0xe6   : > { %v613_v20 = vpop.f32.mrf.mxu1  ;;  %v509_v25 = vadd.f32 %v2276_v33, %v508_v15  ;;  %v765_v43 = vrot.slane %v2336_v23, 1  ;;  %v2376_v55 = vmax.f32 %v517_v31, 0.0  ;;  %v821_v3 = vsel %vm752_vm5, 0.0, %v762_v52 }
  0xe7   : > { %v2340_v24 = vsel %vm2308_vm3, 0.0, %v625_v13  ;;  %v1855_v26 = vpop.f32.mrf.mxu0  ;;  %v614_v35 = vadd.f32 %v2276_v33, %v613_v20  ;;  %v628_v56 = vmax.f32 %v622_v32, 0.0  ;;  %v2000_v13 = vpack.i.bf16 %v821_v3, %v760_v51 }
  0xe8   : > { %v667_v30 = vrot.slane %v2340_v24, 7  ;;  %v2351_v34 = vmax.f32 %v509_v25, 0.0  ;;  %v530_v45 = vadd.f32 %v1855_v26, %v2276_v33  ;;  %1996 = vrot.lane.b32.xlu0 %v1995_v49, %s2146_s17  ;;  %v766_v14 = vsel %vm753_vm6, %v763_v18, %v765_v43 }
  0xe9   : > { %v521_v36 = vpop.f32.mrf.mxu0  ;;  %v626_v62 = vmax.f32 %v614_v35, 0.0  ;;  %v823_v25 = vsel %vm752_vm5, 0.0, %v766_v14  ;;  %2001 = vrot.lane.b32.xlu1 %v2000_v13, %s2147_s20  ;;  %v2406_v32 = vsel %vm2332_vm7, 0.0, %v627_v42  ;;  %v771_v35 = vrot.slane %v2376_v55, 1 }
  0xea   : > { %v726_v40 = vsel %vm666_vm2, 0.0, %v667_v30  ;;  %v767_v59 = vrot.slane %v2351_v34, 1  ;;  %v522_v4 = vadd.f32 %v2276_v33, %v521_v36  ;;  %v2015_v9 = vpack.i.bf16 %v2351_v34, %v2336_v23 }
  0xeb   : > { %v2364_v44 = vsel %vm644_vm4, 0.0, %v726_v40  ;;  %v1856_v47 = vpop.f32.mrf.mxu0  ;;  %v2386_v10 = vmax.f32 %v530_v45, 0.0  ;;  %v2005_v26 = vpack.i.bf16 %v823_v25, %v764_v21  ;;  %v2411_v1 = vsel %vm2308_vm3, 0.0, %v626_v62 }
  0xec   : > { %v533_v5 = vadd.f32 %v1856_v47, %v2276_v33  ;;  %v2390_v19 = vmax.f32 %v522_v4, 0.0  ;;  %v768_v31 = vsel %vm753_vm6, %v765_v43, %v767_v59  ;;  %2016 = vrot.lane.b32.xlu0 %v2015_v9, %s2146_s17  ;;  %v696_v45 = vrot.slane %v2356_v39, 7 }
  0xed   : > { %v524_v63 = vpop.f32.mrf.mxu0  ;;  %v777_v36 = vrot.slane %v2386_v10, 1  ;;  %v783_v47 = vrot.slane %v2356_v39, 1  ;;  %v682_v51 = vrot.slane %v2346_v29, 7  ;;  %v702_v52 = vrot.slane %v2406_v32, 7  ;;  %2006 = vrot.lane.b32.xlu1 %v2005_v26, %s2147_s20 }
  0xee   : > { %v525_v15 = vadd.f32 %v2276_v33, %v524_v63  ;;  %v2392_v20 = vmax.f32 %v533_v5, 0.0  ;;  %v770_v33 = vsel %vm753_vm6, %v767_v59, %v769_v48  ;;  %v773_v18 = vrot.slane %v2390_v19, 1 }
  0xef   : > { %v825_v42 = vsel %vm752_vm5, 0.0, %v770_v33  ;;  %v2427_v59 = vsel %vm2332_vm7, 0.0, %v628_v56  ;;  %v789_v63 = vrot.slane %v2406_v32, 1  ;;  %v668_v3 = vrot.slane %v2411_v1, 7 }
  0xf0   : > { %v2400_v28 = vmax.f32 %v525_v15, 0.0  ;;  %v779_v40 = vrot.slane %v2392_v20, 1  ;;  %v2020_v0 = vpack.i.bf16 %v825_v42, %v768_v31  ;;  %v774_v49 = vsel %vm753_vm6, %v771_v35, %v773_v18  ;;  %v1029_v42 = vld [vmem:[%s2906_s4] sm:$0x7] }
  0xf1   : > { %v827_v5 = vsel %vm752_vm5, 0.0, %v774_v49  ;;  %v2010_v22 = vpack.i.bf16 %v2376_v55, %v2346_v29  ;;  %v678_v14 = vrot.slane %v2336_v23, 7  ;;  %v684_v15 = vrot.slane %v2376_v55, 7  ;;  %1945 = vmatprep.subr.msk.bf16.mxu0 %vm1057_vm8, %v1029_v42 }
  0xf2   : > { %v775_v43 = vrot.slane %v2400_v28, 1  ;;  %2021 = vrot.lane.b32.xlu0 %v2020_v0, %s2147_s20  ;;  %v2035_v4 = vpack.i.bf16 %v2400_v28, %v2390_v19  ;;  %v782_v13 = vsel %vm753_vm6, %v779_v40, %v781_v16  ;;  %v704_v21 = vrot.slane %v2427_v59, 7  ;;  %v1774_v0 = vld [vmem:[%s2906_s4 + $0x8] sm:$0x7] }
  0xf3   : > { %v772_v25 = vsel %vm753_vm6, %v769_v48, %v771_v35  ;;  %v680_v26 = vrot.slane %v2351_v34, 7  ;;  %v690_v29 = vrot.slane %v2386_v10, 7  ;;  %v686_v31 = vrot.slane %v2390_v19, 7  ;;  %2011 = vrot.lane.b32.xlu1 %v2010_v22, %s2146_s17 }
  0xf4   : > { %v778_v62 = vsel %vm753_vm6, %v775_v43, %v777_v36  ;;  %v776_v56 = vsel %vm753_vm6, %v773_v18, %v775_v43  ;;  %v2025_v33 = vpack.i.bf16 %v827_v5, %v772_v25  ;;  %v692_v18 = vrot.slane %v2392_v20, 7 }
  0xf5   : > { %v829_v9 = vsel %vm752_vm5, 0.0, %v778_v62  ;;  %v780_v55 = vsel %vm753_vm6, %v777_v36, %v779_v40  ;;  %v831_v43 = vsel %vm752_vm5, 0.0, %v782_v13  ;;  %v688_v48 = vrot.slane %v2400_v28, 7  ;;  %v1757_v36 = vld [vmem:[%s2906_s4 + $0x4] sm:$0x7] }
  0xf6   : > { %2036 = vrot.lane.b32.xlu0 %v2035_v4, %s2146_s17  ;;  %v2045_v23 = vpack.i.bf16 %v829_v9, %v776_v56  ;;  %v2030_v34 = vpack.i.bf16 %v2392_v20, %v2386_v10  ;;  %v2050_v19 = vpack.i.bf16 %v2356_v39, %v2300_v57  ;;  %v671_v35 = vsel %vm666_vm2, %v668_v3, %v670_v7 }
  0xf7   : > { %v784_v28 = vsel %vm753_vm6, %v781_v16, %v783_v47  ;;  %v786_v10 = vsel %vm753_vm6, %v783_v47, %v785_v6  ;;  %v2483_v20 = vsel %vm666_vm2, %v670_v7, %v672_v38  ;;  %v2487_v40 = vsel %vm644_vm4, 0.0, %v671_v35  ;;  %2026 = vrot.lane.b32.xlu1 %v2025_v33, %s2147_s20  ;;  %1944 = vmatprep.subr.msk.bf16.mxu1 %vm1057_vm8, %v1757_v36 }
  0xf8   : > { %v2040_v16 = vpack.i.bf16 %v831_v43, %v780_v55  ;;  %v675_v47 = vsel %vm666_vm2, %v672_v38, %v674_v60  ;;  %v2503_v7 = vsel %vm666_vm2, %v674_v60, %v676_v17  ;;  %v1059_v58 = vsel %vm1057_vm8, %v1757_v36, 0 }
  0xf9   : > { %v2511_v49 = vsel %vm644_vm4, 0.0, %v675_v47  ;;  %v679_v46 = vsel %vm666_vm2, %v676_v17, %v678_v14  ;;  %v2519_v60 = vsel %vm666_vm2, %v678_v14, %v680_v26  ;;  %v833_v38 = vsel %vm752_vm5, 0.0, %v786_v10  ;;  %1868 = vmatpush3.bf16.msra.mxu1 %v1059_v58 }
  0xfa   : > { %2046 = vrot.lane.b32.xlu0 %v2045_v23, %s2147_s20  ;;  %v2525_v62 = vsel %vm644_vm4, 0.0, %v679_v46  ;;  %v683_v4 = vsel %vm666_vm2, %v680_v26, %v682_v51  ;;  %v2529_v5 = vsel %vm666_vm2, %v682_v51, %v684_v15  ;;  %1946 = vmatprep.subr.msk.bf16.mxu1 %vm1057_vm8, %v1774_v0  ;;  %v2538_v17 = vsel %vm1057_vm8, %v1774_v0, 0 }
  0xfb   : > { %v2534_v61 = vsel %vm644_vm4, 0.0, %v683_v4  ;;  %v687_v22 = vsel %vm666_vm2, %v684_v15, %v686_v31  ;;  %v2542_v56 = vsel %vm666_vm2, %v686_v31, %v688_v48  ;;  %2031 = vrot.lane.b32.xlu1 %v2030_v34, %s2146_s17  ;;  %v1162_v9 = vsel %vm1057_vm8, %v1029_v42, 0 }
  0xfc   : > { %v2547_v51 = vsel %vm644_vm4, 0.0, %v687_v22  ;;  %v691_v13 = vsel %vm666_vm2, %v688_v48, %v690_v29  ;;  %v2552_v14 = vsel %vm666_vm2, %v690_v29, %v692_v18  ;;  %1886 = vmatpush3.bf16.msra.mxu0 %v1162_v9  ;;  %v695_v25 = vsel %vm666_vm2, %v692_v18, %v694_v12 }
  0xfd   : > { %v2557_v15 = vsel %vm644_vm4, 0.0, %v691_v13  ;;  %v2567_v26 = vsel %vm666_vm2, %v694_v12, %v696_v45  ;;  %v699_v29 = vsel %vm666_vm2, %v696_v45, %v698_v2  ;;  %v2576_v31 = vsel %vm644_vm4, 0.0, %v695_v25 }
  0xfe   : > { %2051 = vrot.lane.b32.xlu0 %v2050_v19, %s2146_s17  ;;  %v2583_v33 = vsel %vm666_vm2, %v698_v2, %v700_v27  ;;  %v2587_v57 = vsel %vm644_vm4, 0.0, %v699_v29  ;;  %v2594_v12 = vsel %vm666_vm2, %v667_v30, %v668_v3  ;;  %v2060_v39 = vpack.i.bf16 %v833_v38, %v784_v28 }
  0xff   : > { %v703_v45 = vsel %vm666_vm2, %v700_v27, %v702_v52  ;;  %v2606_v2 = vsel %vm666_vm2, %v702_v52, %v704_v21  ;;  %v755_v18 = vrot.slane %v2411_v1, 1  ;;  %2041 = vrot.lane.b32.xlu1 %v2040_v16, %s2147_s20  ;;  %v790_v30 = vsel %vm753_vm6, %v787_v37, %v789_v63 }
 0x100   : > { %v2617_v27 = vsel %vm644_vm4, 0.0, %v703_v45  ;;  %v2055_v52 = vpack.i.bf16 %v2320_v8, %v2292_v50  ;;  %v754_v3 = vrot.slane %v2340_v24, 1  ;;  %v2070_v21 = vpack.i.bf16 %v2411_v1, %v2340_v24 }
 0x101   : > { %v788_v23 = vsel %vm753_vm6, %v785_v6, %v787_v37  ;;  %v835_v41 = vsel %vm752_vm5, 0.0, %v790_v30  ;;  %v791_v55 = vrot.slane %v2427_v59, 1  ;;  %v758_v43 = vsel %vm753_vm6, %v755_v18, %v757_v11 }
 0x102   : > { %2061 = vrot.lane.b32.xlu0 %v2060_v39, %s2147_s20  ;;  %v2065_v24 = vpack.i.bf16 %v835_v41, %v788_v23  ;;  %v2080_v8 = vpack.i.bf16 %v2427_v59, %v2406_v32  ;;  %v756_v50 = vsel %vm753_vm6, %v754_v3, %v755_v18  ;;  %v819_v6 = vsel %vm752_vm5, 0.0, %v758_v43 }
 0x103   : > { %2056 = vrot.lane.b32.xlu1 %v2055_v52, %s2146_s17  ;;  %v813_v37 = vsel %vm753_vm6, %v791_v55, 0.0  ;;  %v2075_v54 = vpack.i.bf16 %v819_v6, %v756_v50  ;;  %v792_v11 = vsel %vm753_vm6, %v789_v63, %v791_v55 }
 0x104   : > { %v837_v1 = vsel %vm752_vm5, 0.0, %v813_v37 }
 0x105   : > { %v2085_v59 = vpack.i.bf16 %v837_v1, %v792_v11 }
 0x106   : > { %2071 = vrot.lane.b32.xlu0 %v2070_v21, %s2146_s17 }
 0x107   : > { %2066 = vrot.lane.b32.xlu1 %v2065_v24, %s2147_s20 }
 0x10a   : > { %2081 = vrot.lane.b32.xlu0 %v2080_v8, %s2146_s17 }
 0x10b   : > { %2076 = vrot.lane.b32.xlu1 %v2075_v54, %s2147_s20 }
 0x10f   : > { %2086 = vrot.lane.b32.xlu1 %v2085_v59, %s2147_s20 }
 0x156   : > { %v1992_v48 = vpop.permute.xlu0 %1991 }
 0x157   : > { %v1994_v19 = vunpack.i.h.bf16 %v1992_v48  ;;  %v1993_v35 = vunpack.i.l.bf16 %v1992_v48 }
 0x159   : > { %v981_v32 = vsel %vm978_vm9, %v2487_v40, %v1993_v35  ;;  %v982_v53 = vsel %vm978_vm9, %v2483_v20, %v1994_v19 }
 0x15a   : > { %v1997_v34 = vpop.permute.xlu0 %1996 }
 0x15b   : > { %v2002_v36 = vpop.permute.xlu1 %2001  ;;  %v1999_v63 = vunpack.i.h.bf16 %v1997_v34  ;;  %v1998_v16 = vunpack.i.l.bf16 %v1997_v34 }
 0x15c   : > { %v2004_v28 = vunpack.i.h.bf16 %v2002_v36  ;;  %v2003_v10 = vunpack.i.l.bf16 %v2002_v36 }
 0x15d   : > { %v984_v40 = vsel %vm978_vm9, %v2503_v7, %v1999_v63  ;;  %v983_v20 = vsel %vm978_vm9, %v2511_v49, %v1998_v16 }
 0x15e   : > { %v2017_v42 = vpop.permute.xlu0 %2016  ;;  %v1001_v47 = vsel %vm426_vm1, %v981_v32, %v2003_v10  ;;  %v1002_v0 = vsel %vm426_vm1, %v982_v53, %v2004_v28 }
 0x15f   : > { %v2019_v58 = vunpack.i.h.bf16 %v2017_v42  ;;  %v2018_v46 = vunpack.i.l.bf16 %v2017_v42  ;;  %v2659_v38 = vpack.c.bf16 %v1002_v0, %v1001_v47  ;;  %v2007_v4 = vpop.permute.xlu1 %2006 }
 0x160   : > { %v2009_v22 = vunpack.i.h.bf16 %v2007_v4  ;;  %v2008_v9 = vunpack.i.l.bf16 %v2007_v4 }
 0x161   : > { %1869 = vmatprep.mubr.msk.bf16.mxu1 %vm1032_vm10, %v2659_v38  ;;  %v986_v39 = vsel %vm978_vm9, %v2519_v60, %v2019_v58  ;;  %v985_v45 = vsel %vm978_vm9, %v2525_v62, %v2018_v46 }
 0x162   : > { %v1004_v18 = vsel %vm426_vm1, %v984_v40, %v2009_v22  ;;  %v1003_v30 = vsel %vm426_vm1, %v983_v20, %v2008_v9 }
 0x163   : > { %v2673_v52 = vpack.c.bf16 %v1004_v18, %v1003_v30 }
 0x164   : > { %v2022_v13 = vpop.permute.xlu0 %2021 }
 0x165   : > { %v2024_v25 = vunpack.i.h.bf16 %v2022_v13  ;;  %v2023_v29 = vunpack.i.l.bf16 %v2022_v13  ;;  %v2012_v3 = vpop.permute.xlu1 %2011  ;;  %1870 = vmatmul.mubr.msk.bf16.vlgmr.msra.gmra.mxu1 %vm1032_vm10, %v2673_v52 }
 0x166   : > { %v2014_v41 = vunpack.i.h.bf16 %v2012_v3  ;;  %v2013_v55 = vunpack.i.l.bf16 %v2012_v3  ;;  %1904 = vmatpush3.bf16.msra.mxu1 %v2538_v17 }
 0x167   : > { %v1005_v7 = vsel %vm426_vm1, %v985_v45, %v2023_v29  ;;  %v1006_v49 = vsel %vm426_vm1, %v986_v39, %v2024_v25 }
 0x168   : > { %v2677_v21 = vpack.c.bf16 %v1006_v49, %v1005_v7  ;;  %v2037_v23 = vpop.permute.xlu0 %2036  ;;  %v988_v6 = vsel %vm978_vm9, %v2529_v5, %v2014_v41  ;;  %v987_v37 = vsel %vm978_vm9, %v2534_v61, %v2013_v55 }
 0x169   : > { %v2039_v60 = vunpack.i.h.bf16 %v2037_v23  ;;  %v2038_v62 = vunpack.i.l.bf16 %v2037_v23  ;;  %v2027_v43 = vpop.permute.xlu1 %2026 }
 0x16a   : > { %1873 = vmatprep.mubr.msk.bf16.mxu1 %vm1032_vm10, %v2677_v21  ;;  %v2029_v24 = vunpack.i.h.bf16 %v2027_v43  ;;  %v2028_v8 = vunpack.i.l.bf16 %v2027_v43 }
 0x16b   : > { %v990_v17 = vsel %vm978_vm9, %v2542_v56, %v2039_v60  ;;  %v989_v1 = vsel %vm978_vm9, %v2547_v51, %v2038_v62 }
 0x16c   : > { %v2047_v50 = vpop.permute.xlu0 %2046  ;;  %v1007_v59 = vsel %vm426_vm1, %v987_v37, %v2028_v8  ;;  %v1008_v48 = vsel %vm426_vm1, %v988_v6, %v2029_v24 }
 0x16d   : > { %v2049_v54 = vunpack.i.h.bf16 %v2047_v50  ;;  %v2048_v11 = vunpack.i.l.bf16 %v2047_v50  ;;  %v2694_v34 = vpack.c.bf16 %v1008_v48, %v1007_v59  ;;  %v2032_v35 = vpop.permute.xlu1 %2031 }
 0x16e   : > { %v2034_v28 = vunpack.i.h.bf16 %v2032_v35  ;;  %v2033_v10 = vunpack.i.l.bf16 %v2032_v35 }
 0x16f   : > { %v1009_v19 = vsel %vm426_vm1, %v989_v1, %v2048_v11  ;;  %v1010_v5 = vsel %vm426_vm1, %v990_v17, %v2049_v54  ;;  %1874 = vmatmul.mubr.msk.bf16.gmra.mxu1 %vm1032_vm10, %v2694_v34 }
 0x170   : > { %v2698_v61 = vpack.c.bf16 %v1010_v5, %v1009_v19  ;;  %v2052_v36 = vpop.permute.xlu0 %2051  ;;  %v992_v16 = vsel %vm978_vm9, %v2552_v14, %v2034_v28  ;;  %v991_v47 = vsel %vm978_vm9, %v2557_v15, %v2033_v10 }
 0x171   : > { %v2054_v56 = vunpack.i.h.bf16 %v2052_v36  ;;  %v2053_v51 = vunpack.i.l.bf16 %v2052_v36  ;;  %v2042_v42 = vpop.permute.xlu1 %2041 }
 0x172   : > { %1877 = vmatprep.mubr.msk.bf16.mxu1 %vm1032_vm10, %v2698_v61  ;;  %v2044_v32 = vunpack.i.h.bf16 %v2042_v42  ;;  %v2043_v53 = vunpack.i.l.bf16 %v2042_v42 }
 0x173   : > { %v994_v46 = vsel %vm978_vm9, %v2567_v26, %v2054_v56  ;;  %v993_v4 = vsel %vm978_vm9, %v2576_v31, %v2053_v51 }
 0x174   : > { %v2062_v63 = vpop.permute.xlu0 %2061  ;;  %v1011_v22 = vsel %vm426_vm1, %v991_v47, %v2043_v53  ;;  %v1012_v9 = vsel %vm426_vm1, %v992_v16, %v2044_v32 }
 0x175   : > { %v2064_v0 = vunpack.i.h.bf16 %v2062_v63  ;;  %v2063_v58 = vunpack.i.l.bf16 %v2062_v63  ;;  %v1025_v13 = vpack.c.bf16 %v1012_v9, %v1011_v22  ;;  %v2057_v20 = vpop.permute.xlu1 %2056 }
 0x176   : > { %v2059_v29 = vunpack.i.h.bf16 %v2057_v20  ;;  %v2058_v39 = vunpack.i.l.bf16 %v2057_v20 }
 0x177   : > { %v1013_v40 = vsel %vm426_vm1, %v993_v4, %v2063_v58  ;;  %v1014_v14 = vsel %vm426_vm1, %v994_v46, %v2064_v0  ;;  %1878 = vmatmul.mubr.msk.bf16.gmra.mxu1 %vm1032_vm10, %v1025_v13 }
 0x178   : > { %v1026_v25 = vpack.c.bf16 %v1014_v14, %v1013_v40  ;;  %v2072_v15 = vpop.permute.xlu0 %2071  ;;  %v996_v18 = vsel %vm978_vm9, %v2583_v33, %v2059_v29  ;;  %v995_v30 = vsel %vm978_vm9, %v2587_v57, %v2058_v39 }
 0x179   : > { %v2067_v26 = vpop.permute.xlu1 %2066  ;;  %v2074_v7 = vunpack.i.h.bf16 %v2072_v15  ;;  %v2073_v49 = vunpack.i.l.bf16 %v2072_v15 }
 0x17a   : > { %1881 = vmatprep.mubr.msk.bf16.mxu1 %vm1032_vm10, %v1026_v25  ;;  %v2069_v31 = vunpack.i.h.bf16 %v2067_v26  ;;  %v2068_v45 = vunpack.i.l.bf16 %v2067_v26 }
 0x17b   : > { %v980_v24 = vsel %vm978_vm9, %v2594_v12, %v2074_v7  ;;  %v979_v33 = vsel %vm978_vm9, %v2364_v44, %v2073_v49 }
 0x17c   : > { %v1015_v3 = vsel %vm426_vm1, %v995_v30, %v2068_v45  ;;  %v1016_v23 = vsel %vm426_vm1, %v996_v18, %v2069_v31  ;;  %v2082_v41 = vpop.permute.xlu0 %2081 }
 0x17d   : > { %v1027_v55 = vpack.c.bf16 %v1016_v23, %v1015_v3  ;;  %v2077_v60 = vpop.permute.xlu1 %2076  ;;  %v2084_v8 = vunpack.i.h.bf16 %v2082_v41  ;;  %v2083_v50 = vunpack.i.l.bf16 %v2082_v41 }
 0x17e   : > { %v2079_v62 = vunpack.i.h.bf16 %v2077_v60  ;;  %v2078_v43 = vunpack.i.l.bf16 %v2077_v60 }
 0x17f   : > { %1882 = vmatmul.mubr.msk.bf16.gmra.mxu1 %vm1032_vm10, %v1027_v55  ;;  %v998_v12 = vsel %vm978_vm9, %v2606_v2, %v2084_v8  ;;  %v997_v44 = vsel %vm978_vm9, %v2617_v27, %v2083_v50  ;;  %v1429_v2 = vld [vmem:[%s2908_s6] sm:$0x1] }
 0x180   : > { %v1000_v57 = vsel %vm426_vm1, %v980_v24, %v2079_v62  ;;  %v999_v6 = vsel %vm426_vm1, %v979_v33, %v2078_v43  ;;  %1905 = vmatprep.mubr.msk.bf16.mxu1 %vm1032_vm10, %v2673_v52  ;;  %1947 = vmatprep.subr.msk.bf16.mxu0 %vm666_vm2, %v1429_v2  ;;  %v1462_v27 = vsel %vm666_vm2, %v1429_v2, 0 }
 0x181   : > { %v1019_v37 = vpack.c.bf16 %v1000_v57, %v999_v6  ;;  %v2087_v54 = vpop.permute.xlu1 %2086 }
 0x182   : > { %v2089_v11 = vunpack.i.h.bf16 %v2087_v54  ;;  %v2088_v17 = vunpack.i.l.bf16 %v2087_v54 }
 0x183   : > { %1887 = vmatprep.mubr.msk.bf16.mxu0 %vm1032_vm10, %v1019_v37 }
 0x184   : > { %v1018_v1 = vsel %vm426_vm1, %v998_v12, %v2089_v11  ;;  %v1017_v59 = vsel %vm426_vm1, %v997_v44, %v2088_v17  ;;  %1888 = vmatmul.mubr.msk.bf16.vlgmr.msra.gmra.mxu0 %vm1032_vm10, %v2659_v38 }
 0x185   : > { %v1028_v48 = vpack.c.bf16 %v1018_v1, %v1017_v59  ;;  %1891 = vmatprep.mubr.msk.bf16.mxu0 %vm1032_vm10, %v2673_v52  ;;  %1922 = vmatpush3.bf16.msra.mxu0 %v1462_v27 }
 0x187   : > { %1906 = vmatmul.mubr.msk.bf16.vlgmr.msra.gmra.mxu1 %vm1032_vm10, %v2677_v21 }
 0x188   : > { %1909 = vmatprep.mubr.msk.bf16.mxu1 %vm1032_vm10, %v2694_v34 }
 0x18c   : > { %1892 = vmatmul.mubr.msk.bf16.gmra.mxu0 %vm1032_vm10, %v2677_v21 }
 0x18d   : > { %1895 = vmatprep.mubr.msk.bf16.mxu0 %vm1032_vm10, %v2694_v34 }
 0x18f   : > { %1910 = vmatmul.mubr.msk.bf16.gmra.mxu1 %vm1032_vm10, %v2698_v61 }
 0x190   : > { %1913 = vmatprep.mubr.msk.bf16.mxu1 %vm1032_vm10, %v1025_v13 }
 0x194   : > { %1896 = vmatmul.mubr.msk.bf16.gmra.mxu0 %vm1032_vm10, %v2698_v61 }
 0x195   : > { %1899 = vmatprep.mubr.msk.bf16.mxu0 %vm1032_vm10, %v1025_v13 }
 0x197   : > { %1914 = vmatmul.mubr.msk.bf16.gmra.mxu1 %vm1032_vm10, %v1026_v25 }
 0x198   : > { %1917 = vmatprep.mubr.msk.bf16.mxu1 %vm1032_vm10, %v1027_v55 }
 0x19c   : > { %1900 = vmatmul.mubr.msk.bf16.gmra.mxu0 %vm1032_vm10, %v1026_v25  ;;  %v2780_v25 = vld [vmem:[%s2907_s5] ss:$0 sm:$0xff] }
 0x19f   : > { %1918 = vmatmul.mubr.msk.bf16.gmra.mxu1 %vm1032_vm10, %v1028_v48 }
 0x225   : > { %v1871_v38 = vpop.f32.mrf.mxu1 }
 0x227   : > { %v1095_v52 = vpop.f32.mrf.mxu1 }
 0x229   : > { %v1872_v21 = vpop.f32.mrf.mxu1 }
 0x22b   : > { %v1098_v34 = vpop.f32.mrf.mxu1 }
 0x22f   : > { %v1875_v19 = vpop.f32.mrf.mxu1 }
 0x231   : > { %v1111_v5 = vpop.f32.mrf.mxu1 }
 0x233   : > { %v1876_v35 = vpop.f32.mrf.mxu1 }
 0x235   : > { %v1114_v61 = vpop.f32.mrf.mxu1 }
 0x237   : > { %v1879_v36 = vpop.f32.mrf.mxu1 }
 0x239   : > { %v1127_v28 = vpop.f32.mrf.mxu1 }
 0x23b   : > { %v1880_v10 = vpop.f32.mrf.mxu1 }
 0x23d   : > { %v2767_v56 = vpop.f32.mrf.mxu1 }
 0x23f   : > { %v2769_v51 = vpop.f32.mrf.mxu1 }
 0x241   : > { %v2771_v42 = vpop.f32.mrf.mxu1 }
 0x243   : > { %v2773_v32 = vpop.f32.mrf.mxu1 }
 0x244   : > { %v1889_v53 = vpop.f32.mrf.mxu0 }
 0x245   : > { %v2775_v63 = vpop.f32.mrf.mxu1  ;;  %v1207_v47 = vadd.f32 %v1889_v53, %v1871_v38 }
 0x246   : > { %v1198_v16 = vpop.f32.mrf.mxu0 }
 0x247   : > { %v1199_v0 = vadd.f32 %v1198_v16, %v1095_v52  ;;  %v1907_v58 = vpop.f32.mrf.mxu1 }
 0x248   : > { %v1890_v46 = vpop.f32.mrf.mxu0  ;;  %v1368_v40 = vadd.f32 %v1907_v58, %v1207_v47 }
 0x249   : > { %v1210_v4 = vadd.f32 %v1890_v46, %v1872_v21  ;;  %v1303_v22 = vpop.f32.mrf.mxu1 }
 0x24a   : > { %v1366_v9 = vadd.f32 %v1303_v22, %v1199_v0  ;;  %v1201_v13 = vpop.f32.mrf.mxu0  ;;  %v1391_v30 = vadd.f32 %v2780_v25, %v1368_v40 }
 0x24b   : > { %v1202_v14 = vadd.f32 %v1201_v13, %v1098_v34  ;;  %v1908_v20 = vpop.f32.mrf.mxu1 }
 0x24c   : > { %v1369_v15 = vadd.f32 %v1908_v20, %v1210_v4  ;;  %v1893_v29 = vpop.f32.mrf.mxu0  ;;  %v1389_v26 = vadd.f32 %v2780_v25, %v1366_v9  ;;  %v1407_v50 = vmax.f32 %v1391_v30, 0.0 }
 0x24d   : > { %v1306_v39 = vpop.f32.mrf.mxu1  ;;  %v1223_v7 = vadd.f32 %v1893_v29, %v1875_v19 }
 0x24e   : > { %v1392_v31 = vadd.f32 %v2780_v25, %v1369_v15  ;;  %v1367_v45 = vadd.f32 %v1306_v39, %v1202_v14  ;;  %v1214_v18 = vpop.f32.mrf.mxu0  ;;  %v1405_v43 = vmax.f32 %v1389_v26, 0.0 }
 0x24f   : > { %v1215_v49 = vadd.f32 %v1214_v18, %v1111_v5  ;;  %v1911_v3 = vpop.f32.mrf.mxu1 }
 0x250   : > { %v1390_v23 = vadd.f32 %v2780_v25, %v1367_v45  ;;  %v1894_v41 = vpop.f32.mrf.mxu0  ;;  %v1408_v55 = vmax.f32 %v1392_v31, 0.0  ;;  %v1372_v57 = vadd.f32 %v1911_v3, %v1223_v7 }
 0x251   : > { %v1226_v60 = vadd.f32 %v1894_v41, %v1876_v35  ;;  %v1319_v62 = vpop.f32.mrf.mxu1 }
 0x252   : > { %v1406_v24 = vmax.f32 %v1390_v23, 0.0  ;;  %v1370_v33 = vadd.f32 %v1319_v62, %v1215_v49  ;;  %v1217_v8 = vpop.f32.mrf.mxu0  ;;  %v1422_v12 = vpack.c.bf16 %v1408_v55, %v1407_v50  ;;  %v1395_v27 = vadd.f32 %v2780_v25, %v1372_v57 }
 0x253   : > { %v1218_v6 = vadd.f32 %v1217_v8, %v1114_v61  ;;  %v1912_v37 = vpop.f32.mrf.mxu1 }
 0x254   : > { %v1421_v54 = vpack.c.bf16 %v1406_v24, %v1405_v43  ;;  %v1373_v11 = vadd.f32 %v1912_v37, %v1226_v60  ;;  %v1897_v17 = vpop.f32.mrf.mxu0  ;;  %v1393_v1 = vadd.f32 %v2780_v25, %v1370_v33  ;;  %v1411_v58 = vmax.f32 %v1395_v27, 0.0 }
 0x255   : > { %v1322_v44 = vpop.f32.mrf.mxu1  ;;  %v1239_v38 = vadd.f32 %v1897_v17, %v1879_v36 }
 0x256   : > { %v1396_v59 = vadd.f32 %v2780_v25, %v1373_v11  ;;  %v1371_v48 = vadd.f32 %v1322_v44, %v1218_v6  ;;  %v1230_v2 = vpop.f32.mrf.mxu0  ;;  %1923 = vmatprep.mubr.msk.bf16.mxu0 %vm978_vm9, %v1421_v54  ;;  %v1409_v53 = vmax.f32 %v1393_v1, 0.0  ;;  %v2814_v44 = vld [vmem:[%s2909_s7] ss:$0 sm:$0xff] }
 0x257   : > { %v1231_v52 = vadd.f32 %v1230_v2, %v1127_v28  ;;  %v1915_v21 = vpop.f32.mrf.mxu1  ;;  %1924 = vmatmul.mubr.msk.bf16.vlgmr.msra.gmra.mxu0 %vm978_vm9, %v1422_v12 }
 0x258   : > { %v1394_v34 = vadd.f32 %v2780_v25, %v1371_v48  ;;  %v1898_v19 = vpop.f32.mrf.mxu0  ;;  %v1412_v5 = vmax.f32 %v1396_v59, 0.0  ;;  %v1376_v46 = vadd.f32 %v1915_v21, %v1239_v38  ;;  %v2090_v48 = vld [vmem:[%s2241_s22 + $0x10] sm:$0xff]  ;;  %v2091_v21 = vld [vmem:[%s2241_s22] sm:$0xff] }
 0x259   : > { %v1242_v35 = vadd.f32 %v1898_v19, %v1880_v10  ;;  %v1335_v61 = vpop.f32.mrf.mxu1 }
 0x25a   : > { %v1410_v16 = vmax.f32 %v1394_v34, 0.0  ;;  %v1374_v47 = vadd.f32 %v1335_v61, %v1231_v52  ;;  %v1233_v0 = vpop.f32.mrf.mxu0  ;;  %v1424_v13 = vpack.c.bf16 %v1412_v5, %v1411_v58  ;;  %v1399_v29 = vadd.f32 %v2780_v25, %v1376_v46  ;;  %v2092_v61 = vld [vmem:[%s2241_s22 + $0x18] sm:$0xff]  ;;  %v2093_v58 = vld [vmem:[%s2241_s22 + $0x8] sm:$0xff] }
 0x25b   : > { %v1234_v4 = vadd.f32 %v1233_v0, %v2767_v56  ;;  %v1916_v22 = vpop.f32.mrf.mxu1 }
 0x25c   : > { %v1423_v36 = vpack.c.bf16 %v1410_v16, %v1409_v53  ;;  %v1377_v28 = vadd.f32 %v1916_v22, %v1242_v35  ;;  %v1901_v9 = vpop.f32.mrf.mxu0  ;;  %v1397_v14 = vadd.f32 %v2780_v25, %v1374_v47  ;;  %v1415_v55 = vmax.f32 %v1399_v29, 0.0 }
 0x25d   : > { %v1338_v40 = vpop.f32.mrf.mxu1  ;;  %v1255_v39 = vadd.f32 %v1901_v9, %v2769_v51 }
 0x25e   : > { %v1400_v20 = vadd.f32 %v2780_v25, %v1377_v28  ;;  %v1375_v10 = vadd.f32 %v1338_v40, %v1234_v4  ;;  %v1246_v15 = vpop.f32.mrf.mxu0  ;;  %1927 = vmatprep.mubr.msk.bf16.mxu0 %vm978_vm9, %v1423_v36  ;;  %v1413_v49 = vmax.f32 %v1397_v14, 0.0  ;;  %v2094_v28 = vld [vmem:[%s2241_s22 + $0x30] sm:$0xff] }
 0x25f   : > { %v1247_v56 = vadd.f32 %v1246_v15, %v2771_v42  ;;  %v1919_v26 = vpop.f32.mrf.mxu1  ;;  %1928 = vmatmul.mubr.msk.bf16.gmra.mxu0 %vm978_vm9, %v1424_v13 }
 0x260   : > { %v1398_v31 = vadd.f32 %v2780_v25, %v1375_v10  ;;  %v1902_v45 = vpop.f32.mrf.mxu0  ;;  %v1416_v18 = vmax.f32 %v1400_v20, 0.0  ;;  %v1380_v60 = vadd.f32 %v1919_v26, %v1255_v39  ;;  %v2095_v20 = vld [vmem:[%s2241_s22 + $0x20] sm:$0xff] }
 0x261   : > { %v1258_v30 = vadd.f32 %v1902_v45, %v2773_v32  ;;  %v1351_v7 = vpop.f32.mrf.mxu1 }
 0x262   : > { %v1414_v3 = vmax.f32 %v1398_v31, 0.0  ;;  %v1378_v23 = vadd.f32 %v1351_v7, %v1247_v56  ;;  %v1249_v41 = vpop.f32.mrf.mxu0  ;;  %v1426_v24 = vpack.c.bf16 %v1416_v18, %v1415_v55  ;;  %v1403_v32 = vadd.f32 %v2780_v25, %v1380_v60  ;;  %v2096_v56 = vld [vmem:[%s2241_s22 + $0x38] sm:$0xff] }
 0x263   : > { %v1250_v51 = vadd.f32 %v1249_v41, %v2775_v63  ;;  %v1920_v62 = vpop.f32.mrf.mxu1  ;;  %v2098_v41 = vld [vmem:[%s2241_s22 + $0x50] sm:$0xff] }
 0x264   : > { %v1425_v42 = vpack.c.bf16 %v1414_v3, %v1413_v49  ;;  %v1381_v43 = vadd.f32 %v1920_v62, %v1258_v30  ;;  %v1401_v8 = vadd.f32 %v2780_v25, %v1378_v23  ;;  %v1419_v11 = vmax.f32 %v1403_v32, 0.0  ;;  %v2097_v30 = vld [vmem:[%s2241_s22 + $0x28] sm:$0xff] }
 0x265   : > { %v1354_v33 = vpop.f32.mrf.mxu1 }
 0x266   : > { %v1404_v50 = vadd.f32 %v2780_v25, %v1381_v43  ;;  %v1379_v57 = vadd.f32 %v1354_v33, %v1250_v51  ;;  %1931 = vmatprep.mubr.msk.bf16.mxu0 %vm978_vm9, %v1425_v42  ;;  %v1417_v37 = vmax.f32 %v1401_v8, 0.0  ;;  %v2099_v42 = vld [vmem:[%s2241_s22 + $0x40] sm:$0xff] }
 0x267   : > { %1932 = vmatmul.mubr.msk.bf16.gmra.mxu0 %vm978_vm9, %v1426_v24 }
 0x268   : > { %v1402_v6 = vadd.f32 %v2780_v25, %v1379_v57  ;;  %v1420_v63 = vmax.f32 %v1404_v50, 0.0  ;;  %v2100_v50 = vld [vmem:[%s2241_s22 + $0x58] sm:$0xff] }
 0x26a   : > { %v1418_v54 = vmax.f32 %v1402_v6, 0.0  ;;  %v1428_v12 = vpack.c.bf16 %v1420_v63, %v1419_v11 }
 0x26c   : > { %v1427_v17 = vpack.c.bf16 %v1418_v54, %v1417_v37  ;;  %v2101_v37 = vld [vmem:[%s2241_s22 + $0x48] sm:$0xff] }
 0x26e   : > { %1935 = vmatprep.mubr.msk.bf16.mxu0 %vm978_vm9, %v1427_v17 }
 0x26f   : > { %1936 = vmatmul.mubr.msk.bf16.gmra.mxu0 %vm978_vm9, %v1428_v12 }
 0x317   : > { %v1925_v1 = vpop.f32.mrf.mxu0 }
 0x318   : > { %v1507_v25 = vadd.f32 %v1925_v1, %v2814_v44  ;;  %v2102_v1 = vld [vmem:[%s2241_s22 + $0x70] sm:$0xff] }
 0x319   : > { %v1498_v59 = vpop.f32.mrf.mxu0 }
 0x31a   : > { %v1563_v2 = vadd.f32 %v2090_v48, %v1507_v25  ;;  %v1499_v27 = vadd.f32 %v2814_v44, %v1498_v59 }
 0x31b   : > { %v1926_v38 = vpop.f32.mrf.mxu0 }
 0x31c   : > { %v1579_v52 = vmax.f32 %v1563_v2, 0.0  ;;  %v1561_v34 = vadd.f32 %v2091_v21, %v1499_v27  ;;  %v1510_v19 = vadd.f32 %v1926_v38, %v2814_v44  ;;  %v2103_v27 = vld [vmem:[%s2241_s22 + $0x60] sm:$0xff] }
 0x31d   : > { %v1501_v5 = vpop.f32.mrf.mxu0 }
 0x31e   : > { %1595 = vst.msk [vmem:[%s2824_s21 + $0x10] sm:$0xff] %vm426_vm1, %v1579_v52  ;;  %v1577_v35 = vmax.f32 %v1561_v34, 0.0  ;;  %v1564_v53 = vadd.f32 %v2092_v61, %v1510_v19  ;;  %v1502_v16 = vadd.f32 %v2814_v44, %v1501_v5  ;;  %v2104_v19 = vld [vmem:[%s2241_s22 + $0x78] sm:$0xff] }
 0x31f   : > { %v1929_v47 = vpop.f32.mrf.mxu0 }
 0x320   : > { %1593 = vst.msk [vmem:[%s2824_s21] sm:$0xff] %vm426_vm1, %v1577_v35  ;;  %v1580_v0 = vmax.f32 %v1564_v53, 0.0  ;;  %v1562_v46 = vadd.f32 %v2093_v58, %v1502_v16  ;;  %v1523_v4 = vadd.f32 %v1929_v47, %v2814_v44  ;;  %v2105_v53 = vld [vmem:[%s2241_s22 + $0x68] sm:$0xff] }
 0x321   : > { %v1514_v22 = vpop.f32.mrf.mxu0 }
 0x322   : > { %1596 = vst.msk [vmem:[%s2824_s21 + $0x18] sm:$0xff] %vm426_vm1, %v1580_v0  ;;  %v1578_v36 = vmax.f32 %v1562_v46, 0.0  ;;  %v1567_v9 = vadd.f32 %v2094_v28, %v1523_v4  ;;  %v1515_v13 = vadd.f32 %v2814_v44, %v1514_v22 }
 0x323   : > { %v1930_v40 = vpop.f32.mrf.mxu0 }
 0x324   : > { %1594 = vst.msk [vmem:[%s2824_s21 + $0x8] sm:$0xff] %vm426_vm1, %v1578_v36  ;;  %v1583_v14 = vmax.f32 %v1567_v9, 0.0  ;;  %v1565_v10 = vadd.f32 %v2095_v20, %v1515_v13  ;;  %v1526_v15 = vadd.f32 %v1930_v40, %v2814_v44 }
 0x325   : > { %v1517_v29 = vpop.f32.mrf.mxu0 }
 0x326   : > { %1599 = vst.msk [vmem:[%s2824_s21 + $0x30] sm:$0xff] %vm426_vm1, %v1583_v14  ;;  %v1581_v39 = vmax.f32 %v1565_v10, 0.0  ;;  %v1568_v26 = vadd.f32 %v2096_v56, %v1526_v15  ;;  %v1518_v31 = vadd.f32 %v2814_v44, %v1517_v29 }
 0x327   : > { %v1933_v45 = vpop.f32.mrf.mxu0 }
 0x328   : > { %1597 = vst.msk [vmem:[%s2824_s21 + $0x20] sm:$0xff] %vm426_vm1, %v1581_v39  ;;  %v1584_v18 = vmax.f32 %v1568_v26, 0.0  ;;  %v1566_v7 = vadd.f32 %v2097_v30, %v1518_v31  ;;  %v1539_v49 = vadd.f32 %v1933_v45, %v2814_v44 }
 0x329   : > { %v1530_v3 = vpop.f32.mrf.mxu0 }
 0x32a   : > { %1600 = vst.msk [vmem:[%s2824_s21 + $0x38] sm:$0xff] %vm426_vm1, %v1584_v18  ;;  %v1582_v23 = vmax.f32 %v1566_v7, 0.0  ;;  %v1571_v55 = vadd.f32 %v2098_v41, %v1539_v49  ;;  %v1531_v60 = vadd.f32 %v2814_v44, %v1530_v3 }
 0x32b   : > { %v1934_v51 = vpop.f32.mrf.mxu0 }
 0x32c   : > { %1598 = vst.msk [vmem:[%s2824_s21 + $0x28] sm:$0xff] %vm426_vm1, %v1582_v23  ;;  %v1587_v62 = vmax.f32 %v1571_v55, 0.0  ;;  %v1569_v43 = vadd.f32 %v2099_v42, %v1531_v60  ;;  %v1542_v24 = vadd.f32 %v1934_v51, %v2814_v44 }
 0x32d   : > { %v1533_v33 = vpop.f32.mrf.mxu0 }
 0x32e   : > { %1603 = vst.msk [vmem:[%s2824_s21 + $0x50] sm:$0xff] %vm426_vm1, %v1587_v62  ;;  %v1585_v8 = vmax.f32 %v1569_v43, 0.0  ;;  %v1572_v57 = vadd.f32 %v2100_v50, %v1542_v24  ;;  %v1534_v32 = vadd.f32 %v2814_v44, %v1533_v33 }
 0x32f   : > { %v1937_v6 = vpop.f32.mrf.mxu0 }
 0x330   : > { %1601 = vst.msk [vmem:[%s2824_s21 + $0x40] sm:$0xff] %vm426_vm1, %v1585_v8  ;;  %v1588_v63 = vmax.f32 %v1572_v57, 0.0  ;;  %v1570_v54 = vadd.f32 %v2101_v37, %v1534_v32  ;;  %v1555_v11 = vadd.f32 %v1937_v6, %v2814_v44 }
 0x331   : > { %v1546_v17 = vpop.f32.mrf.mxu0 }
 0x332   : > { %1604 = vst.msk [vmem:[%s2824_s21 + $0x58] sm:$0xff] %vm426_vm1, %v1588_v63  ;;  %v1586_v12 = vmax.f32 %v1570_v54, 0.0  ;;  %v1575_v25 = vadd.f32 %v2102_v1, %v1555_v11  ;;  %v1547_v59 = vadd.f32 %v2814_v44, %v1546_v17 }
 0x333   : > { %v1938_v48 = vpop.f32.mrf.mxu0 }
 0x334   : > { %1602 = vst.msk [vmem:[%s2824_s21 + $0x48] sm:$0xff] %vm426_vm1, %v1586_v12  ;;  %v1591_v2 = vmax.f32 %v1575_v25, 0.0  ;;  %v1573_v38 = vadd.f32 %v2103_v27, %v1547_v59  ;;  %v1558_v52 = vadd.f32 %v1938_v48, %v2814_v44 }
 0x335   : > { %v1549_v21 = vpop.f32.mrf.mxu0 }
 0x336   : > { %1607 = vst.msk [vmem:[%s2824_s21 + $0x70] sm:$0xff] %vm426_vm1, %v1591_v2  ;;  %v1589_v34 = vmax.f32 %v1573_v38, 0.0  ;;  %v1576_v5 = vadd.f32 %v2104_v19, %v1558_v52  ;;  %v1550_v35 = vadd.f32 %v2814_v44, %v1549_v21 }
 0x338   : > { %1605 = vst.msk [vmem:[%s2824_s21 + $0x60] sm:$0xff] %vm426_vm1, %v1589_v34  ;;  %v1592_v61 = vmax.f32 %v1576_v5, 0.0  ;;  %v1574_v16 = vadd.f32 %v2105_v53, %v1550_v35 }
 0x33a   : > { %1608 = vst.msk [vmem:[%s2824_s21 + $0x78] sm:$0xff] %vm426_vm1, %v1592_v61  ;;  %v1590_v47 = vmax.f32 %v1574_v16, 0.0 }
 0x33c   : > { %1606 = vst.msk [vmem:[%s2824_s21 + $0x68] sm:$0xff] %vm426_vm1, %v1590_v47 }
 0x33d PF: > { %s18_s9 = sadd.s32 1, %s2144_s9   ;;  %s2915_s27 = smov %s2136_s29 }
 0x33e   : > { %p15_p10 = scmp.ge.s32.totalorder %s18_s9, 6   ;;  %s2916_s28 = smov %s2140_s30 }
 0x33f   : > { %s2917_s29 = smov %s2920_s10  ;;  %s2918_s30 = smov %s2924_s11 }
 0x340   :  { %17 = sbr.rel (!%p15_p10) target bundleno = 3 (0x3), region = 87 }

</bundles_post_ra>
